<compile_context>
chip_gen: v7x
topology: tpu7x:2x2x1
jax: 0.10.0
libtpu: 0.0.40
codegen_flags: <defaults>
</compile_context>

<pallas_src>
import functools

import jax
import jax.numpy as jnp
from jax.experimental import pallas as pl
from jax.experimental.pallas import tpu as pltpu

LANE = 128


def _round_up(n, m):
    return ((n + m - 1) // m) * m


def _vmem_capacity_bytes():
    """Physical per-core VMEM (128 MiB v5e/v6e, 64 MiB per TC on v7x)."""
    try:
        return int(pltpu.get_tpu_info().vmem_capacity_bytes)
    except Exception:
        return 64 << 20  # conservative (v7x per-TC)


def _vmem_bytes_estimate(tm, In_p, H_p, C_p, x_bytes, out_bytes):
    """Rough VMEM footprint: weights single-buffered, x/out tiles double-buffered."""
    weights = 2 * (3 * In_p * H_p + H_p * C_p)            # bf16 W1, W3a, W4, W5
    biases = 4 * (2 * H_p + In_p + C_p)                   # f32 b1, enc_bias, b4, b5
    io = 2 * tm * (In_p * x_bytes + C_p * out_bytes)      # double-buffered x / out
    live = 4 * tm * (2 * H_p + 2 * In_p)                  # f32 ie, e, d1, x+const slabs
    live += 2 * tm * (2 * H_p + 2 * In_p)                 # bf16 casts fed to the MXU
    return weights + biases + io + live


def _choose_tm(B, In_p, H_p, C_p, x_bytes, out_bytes, vmem_capacity):
    """Largest batch tile that fits the VMEM budget, capped to keep >= 2 grid
    steps so dimension_semantics=("parallel",) can shard across v7x's two
    TensorCores (a no-op on single-TC v5e/v6e)."""
    B8 = _round_up(max(B, 1), 8)
    budget = int(vmem_capacity * 0.75)
    tm = 1024 if vmem_capacity >= (100 << 20) else 512    # bigger tiles on v5e/v6e
    while tm > 8 and _vmem_bytes_estimate(tm, In_p, H_p, C_p,
                                          x_bytes, out_bytes) > budget:
        tm //= 2
    if B8 >= 16:
        tm = min(tm, _round_up(pl.cdiv(B8, 2), 8))        # at least 2 grid steps
    return max(8, min(tm, B8))


def autoencoder_kernel(x_ref, w1_ref, b1_ref, enc_b_ref, w3a_ref,
                       w4_ref, b4_ref, w5_ref, b5_ref, out_ref,
                       *, d_constraint):
    # Load the x tile once; it feeds both the first matmul and the clamp bound.
    x = x_ref[...]                                   # (TM, In_p), f32 or bf16
    x_bf = x.astype(jnp.bfloat16)
    x_f32 = x.astype(jnp.float32)

    # preprocess_input: Linear + ReLU  (bf16 MXU operands, f32 accumulate/VPU)
    ie = jnp.dot(x_bf, w1_ref[...],
                 preferred_element_type=jnp.float32) + b1_ref[...]
    ie = jnp.maximum(ie, 0.0)                        # (TM, H_p)

    # encoder_fc: ie @ W3[:H] + (code-branch folded into enc_bias)
    e = jnp.dot(ie.astype(jnp.bfloat16), w3a_ref[...],
                preferred_element_type=jnp.float32) + enc_b_ref[...]
    # torch.clamp(output, max=input + d_constraint).
    # NOTE: with d_constraint < 0 the zero-padded lanes of e become
    # d_constraint instead of 0; harmless only because the matching padded
    # rows of W4 are zero — keep that invariant in pack_params.
    e = jnp.minimum(e, x_f32 + d_constraint)         # (TM, In_p)

    # decoder: Linear + ReLU + Linear
    d1 = jnp.dot(e.astype(jnp.bfloat16), w4_ref[...],
                 preferred_element_type=jnp.float32) + b4_ref[...]
    d1 = jnp.maximum(d1, 0.0)                        # (TM, H_p)
    y = jnp.dot(d1.astype(jnp.bfloat16), w5_ref[...],
                preferred_element_type=jnp.float32) + b5_ref[...]
    out_ref[...] = y.astype(out_ref.dtype)           # (TM, C_p)


def pack_params(params):
    """One-time prep: split W3, zero-pad feature dims to 128, cast MXU weights to bf16."""
    In, H = params["w1"].shape
    C = params["w5"].shape[1]
    In_p, H_p, C_p = _round_up(In, LANE), _round_up(H, LANE), _round_up(C, LANE)

    def pad2(a, r, c):
        return jnp.pad(a, ((0, r - a.shape[0]), (0, c - a.shape[1])))

    return {
        "In": In, "H": H, "C": C, "In_p": In_p, "H_p": H_p, "C_p": C_p,
        # kernel operands (weights bf16, biases f32, zero-padded -> padding inert)
        "w1": pad2(params["w1"], In_p, H_p).astype(jnp.bfloat16),
        "b1": pad2(params["b1"], 1, H_p),
        "w3a": pad2(params["w3"][:H, :], H_p, In_p).astype(jnp.bfloat16),
        "w4": pad2(params["w4"], In_p, H_p).astype(jnp.bfloat16),
        "b4": pad2(params["b4"], 1, H_p),
        "w5": pad2(params["w5"], H_p, C_p).astype(jnp.bfloat16),
        "b5": pad2(params["b5"], 1, C_p),
        # kept unpadded/f32 for the tiny per-call, batch-independent code fold
        "w2": params["w2"], "b2": params["b2"],
        "w3b": params["w3"][H:, :], "b3": params["b3"],
    }


def autoencoder_forward(x, code, packed, d_constraint, *, tm=None,
                        out_dtype=jnp.float32):
    """x: (B, In) f32/bf16; code: (C,) f32; packed: pack_params(...); -> (B, C)."""
    B, In = x.shape
    In_p, H_p, C_p = packed["In_p"], packed["H_p"], packed["C_p"]
    C = packed["C"]
    assert In == packed["In"]

    x_bytes = jnp.dtype(x.dtype).itemsize
    out_bytes = jnp.dtype(out_dtype).itemsize

    # Fold the batch-independent code branch into a single (1, In_p) encoder
    # bias (tiny O(C*H + H*In) matmul in plain JAX, scheduled around the kernel).
    ce = jnp.maximum(code.reshape(1, -1) @ packed["w2"] + packed["b2"], 0.0)
    enc_bias = ce @ packed["w3b"] + packed["b3"]                     # (1, In)
    if In_p != In:
        enc_bias = jnp.pad(enc_bias, ((0, 0), (0, In_p - In)))       # (1, In_p)

    vmem_cap = _vmem_capacity_bytes()
    if tm is None:
        tm = _choose_tm(B, In_p, H_p, C_p, x_bytes, out_bytes, vmem_cap)
    tm_eff = max(8, min(_round_up(tm, 8), _round_up(B, 8)))
    grid = (pl.cdiv(B, tm_eff),)
    B_p = grid[0] * tm_eff

    # Pad only when the caller's layout is not already aligned: with
    # B % tm == 0 and In % 128 == 0 (pad once in the dataloader / model setup)
    # this is a no-op and x streams straight from the caller's HBM buffer.
    x_in = x if (B_p == B and In_p == In) else jnp.pad(
        x, ((0, B_p - B), (0, In_p - In)))

    vmem_need = _vmem_bytes_estimate(tm_eff, In_p, H_p, C_p, x_bytes, out_bytes)
    vmem_limit = int(min(max(vmem_need * 5 // 4 + (4 << 20), 32 << 20),
                         int(vmem_cap * 0.9)))

    weight_bytes = 2 * (3 * In_p * H_p + H_p * C_p) + 4 * (2 * H_p + In_p + C_p)
    cost = pl.CostEstimate(
        flops=2 * B_p * (3 * In_p * H_p + H_p * C_p),
        transcendentals=0,
        bytes_accessed=B_p * In_p * x_bytes + B_p * C_p * out_bytes + weight_bytes)

    def build(weight_buffers):
        def const(shape):
            if weight_buffers == 1:
                # Constant index_map -> block fetched once and kept VMEM-resident;
                # single-buffering halves weight VMEM vs the default 2-deep pipeline.
                return pl.BlockSpec(shape, lambda i: (0, 0),
                                    pipeline_mode=pl.Buffered(1))
            return pl.BlockSpec(shape, lambda i: (0, 0))

        return pl.pallas_call(
            functools.partial(autoencoder_kernel, d_constraint=float(d_constraint)),
            out_shape=jax.ShapeDtypeStruct((B_p, C_p), out_dtype),
            grid=grid,
            in_specs=[
                pl.BlockSpec((tm_eff, In_p), lambda i: (i, 0)),   # x (batch tiled)
                const((In_p, H_p)),                               # w1
                const((1, H_p)),                                  # b1
                const((1, In_p)),                                 # enc_bias (code fold)
                const((H_p, In_p)),                               # w3a
                const((In_p, H_p)),                               # w4
                const((1, H_p)),                                  # b4
                const((H_p, C_p)),                                # w5
                const((1, C_p)),                                  # b5
            ],
            out_specs=pl.BlockSpec((tm_eff, C_p), lambda i: (i, 0)),
            compiler_params=pltpu.CompilerParams(
                dimension_semantics=("parallel",),                # megacore on v7x
                vmem_limit_bytes=vmem_limit),
            cost_estimate=cost,
        )

    args = (x_in, packed["w1"], packed["b1"], enc_bias, packed["w3a"],
            packed["w4"], packed["b4"], packed["w5"], packed["b5"])
    try:
        out_p = build(weight_buffers=1)(*args)
    except Exception:
        # Fallback for jax builds that reject single-buffered BlockSpecs.
        out_p = build(weight_buffers=2)(*args)

    if B_p != B or C_p != C:
        return out_p[:B, :C]
    return out_p


def init_params(key, input_size, code_size, hidden_size):
    """Deterministic kaiming-normal-style init; weights stored as (in, out)."""
    ks = jax.random.split(key, 10)

    def kaiming(k, fan_in, fan_out):
        std = jnp.sqrt(2.0 / fan_in)
        return jax.random.normal(k, (fan_in, fan_out), jnp.float32) * std

    def bias(k, fan_in, fan_out):
        bound = 1.0 / jnp.sqrt(fan_in)
        return jax.random.uniform(k, (1, fan_out), jnp.float32, -bound, bound)

    return {
        # preprocess_input: Linear(input_size, hidden_size)
        "w1": kaiming(ks[0], input_size, hidden_size), "b1": bias(ks[1], input_size, hidden_size),
        # preprocess_code: Linear(code_size, hidden_size)
        "w2": kaiming(ks[2], code_size, hidden_size), "b2": bias(ks[3], code_size, hidden_size),
        # encoder_fc: Linear(2*hidden_size, input_size)
        "w3": kaiming(ks[4], 2 * hidden_size, input_size), "b3": bias(ks[5], 2 * hidden_size, input_size),
        # decoder[0]: Linear(input_size, hidden_size)
        "w4": kaiming(ks[6], input_size, hidden_size), "b4": bias(ks[7], input_size, hidden_size),
        # decoder[2]: Linear(hidden_size, code_size)
        "w5": kaiming(ks[8], hidden_size, code_size), "b5": bias(ks[9], hidden_size, code_size),
    }


def reference_forward(x, code, params, d_constraint):
    """Full-precision (f32) JAX reference of the PyTorch forward."""
    ie = jnp.maximum(x @ params["w1"] + params["b1"], 0.0)
    ce = jnp.maximum(code.reshape(1, -1) @ params["w2"] + params["b2"], 0.0)
    z = jnp.concatenate([ie, jnp.broadcast_to(ce, ie.shape)], axis=-1)
    e = z @ params["w3"] + params["b3"]
    e = jnp.minimum(e, x + d_constraint)
    d1 = jnp.maximum(e @ params["w4"] + params["b4"], 0.0)
    return d1 @ params["w5"] + params["b5"]


if __name__ == "__main__":
    # Small synthetic shapes consistent with the module's forward.
    B, INPUT_SIZE, CODE_SIZE, HIDDEN_SIZE = 24, 32, 16, 64
    D_CONSTRAINT = 6.0

    key = jax.random.PRNGKey(0)
    k_x, k_c, k_p = jax.random.split(key, 3)

    x = jax.random.normal(k_x, (B, INPUT_SIZE), jnp.float32)      # input_data
    code = jax.random.normal(k_c, (CODE_SIZE,), jnp.float32)      # single code vector
    params = init_params(k_p, INPUT_SIZE, CODE_SIZE, HIDDEN_SIZE)
    packed = pack_params(params)                                  # one-time prep

    ref = reference_forward(x, code, params, D_CONSTRAINT)

    # Run 1: auto tile selection (gives a 2-step grid at this toy batch, which
    # also exercises the megacore-parallel path on v7x).
    out = autoencoder_forward(x, code, packed, D_CONSTRAINT)
    out = jax.block_until_ready(out)
    assert out.shape == (B, CODE_SIZE)
    rel_err = jnp.max(jnp.abs(out - ref)) / (jnp.max(jnp.abs(ref)) + 1e-6)
    assert rel_err < 5e-2, f"auto-tm mismatch vs JAX reference, rel_err={rel_err}"

    # Run 2: explicit small tile (3-step grid with a ragged last tile).
    out2 = autoencoder_forward(x, code, packed, D_CONSTRAINT, tm=8)
    out2 = jax.block_until_ready(out2)
    rel_err2 = jnp.max(jnp.abs(out2 - ref)) / (jnp.max(jnp.abs(ref)) + 1e-6)
    assert rel_err2 < 5e-2, f"tm=8 mismatch vs JAX reference, rel_err={rel_err2}"

    print("KERNEL_OK")
</pallas_src>

<mosaic_0001>
module attributes {stable_mosaic.version = 11 : i64} {
  func.func @autoencoder_kernel(%arg0: i32, %arg1: memref<16x128xf32, #tpu.memory_space<vmem>>, %arg2: memref<128x128xbf16, #tpu.memory_space<vmem>>, %arg3: memref<1x128xf32, #tpu.memory_space<vmem>>, %arg4: memref<1x128xf32, #tpu.memory_space<vmem>>, %arg5: memref<128x128xbf16, #tpu.memory_space<vmem>>, %arg6: memref<128x128xbf16, #tpu.memory_space<vmem>>, %arg7: memref<1x128xf32, #tpu.memory_space<vmem>>, %arg8: memref<128x128xbf16, #tpu.memory_space<vmem>>, %arg9: memref<1x128xf32, #tpu.memory_space<vmem>>, %arg10: memref<16x128xf32, #tpu.memory_space<vmem>>) attributes {dimension_semantics = [#tpu.dimension_semantics<parallel>], iteration_bounds = array<i64: 2>, scalar_prefetch = 0 : i64, scratch_operands = 0 : i64, tpu.core_type = #tpu.core_type<tc>, window_params = [{transform_indices = @transform_0, window_bounds = array<i64: 16, 128>}, {pipeline_mode = #tpu.pipeline_mode<synchronous>, transform_indices = @transform_1, window_bounds = array<i64: 128, 128>}, {pipeline_mode = #tpu.pipeline_mode<synchronous>, transform_indices = @transform_2, window_bounds = array<i64: 1, 128>}, {pipeline_mode = #tpu.pipeline_mode<synchronous>, transform_indices = @transform_3, window_bounds = array<i64: 1, 128>}, {pipeline_mode = #tpu.pipeline_mode<synchronous>, transform_indices = @transform_4, window_bounds = array<i64: 128, 128>}, {pipeline_mode = #tpu.pipeline_mode<synchronous>, transform_indices = @transform_5, window_bounds = array<i64: 128, 128>}, {pipeline_mode = #tpu.pipeline_mode<synchronous>, transform_indices = @transform_6, window_bounds = array<i64: 1, 128>}, {pipeline_mode = #tpu.pipeline_mode<synchronous>, transform_indices = @transform_7, window_bounds = array<i64: 128, 128>}, {pipeline_mode = #tpu.pipeline_mode<synchronous>, transform_indices = @transform_8, window_bounds = array<i64: 1, 128>}, {transform_indices = @transform_9, window_bounds = array<i64: 16, 128>}]} {
    %c0 = arith.constant 0 : index
    %c0_0 = arith.constant 0 : index
    %0 = vector.load %arg1[%c0, %c0_0] : memref<16x128xf32, #tpu.memory_space<vmem>>, vector<16x128xf32>
    %1 = arith.truncf %0 : vector<16x128xf32> to vector<16x128xbf16>
    %c0_1 = arith.constant 0 : index
    %c0_2 = arith.constant 0 : index
    %2 = vector.load %arg2[%c0_1, %c0_2] : memref<128x128xbf16, #tpu.memory_space<vmem>>, vector<128x128xbf16>
    %cst = arith.constant dense<0.000000e+00> : vector<16x128xf32>
    %3 = tpu.matmul %1, %2, %cst {dimension_numbers = #tpu.dot_dimension_numbers<[1], [0], [0], [1], [0, 0, 1, 1], [], []>} : vector<16x128xbf16>, vector<128x128xbf16>, vector<16x128xf32> -> vector<16x128xf32>
    %c0_3 = arith.constant 0 : index
    %c0_4 = arith.constant 0 : index
    %4 = vector.load %arg3[%c0_3, %c0_4] : memref<1x128xf32, #tpu.memory_space<vmem>>, vector<1x128xf32>
    %5 = vector.broadcast %4 : vector<1x128xf32> to vector<16x128xf32>
    %6 = arith.addf %3, %5 : vector<16x128xf32>
    %cst_5 = arith.constant 0.000000e+00 : f32
    %7 = vector.broadcast %cst_5 : f32 to vector<16x128xf32>
    %8 = arith.maximumf %6, %7 : vector<16x128xf32>
    %9 = arith.truncf %8 : vector<16x128xf32> to vector<16x128xbf16>
    %c0_6 = arith.constant 0 : index
    %c0_7 = arith.constant 0 : index
    %10 = vector.load %arg5[%c0_6, %c0_7] : memref<128x128xbf16, #tpu.memory_space<vmem>>, vector<128x128xbf16>
    %cst_8 = arith.constant dense<0.000000e+00> : vector<16x128xf32>
    %11 = tpu.matmul %9, %10, %cst_8 {dimension_numbers = #tpu.dot_dimension_numbers<[1], [0], [0], [1], [0, 0, 1, 1], [], []>} : vector<16x128xbf16>, vector<128x128xbf16>, vector<16x128xf32> -> vector<16x128xf32>
    %c0_9 = arith.constant 0 : index
    %c0_10 = arith.constant 0 : index
    %12 = vector.load %arg4[%c0_9, %c0_10] : memref<1x128xf32, #tpu.memory_space<vmem>>, vector<1x128xf32>
    %13 = vector.broadcast %12 : vector<1x128xf32> to vector<16x128xf32>
    %14 = arith.addf %11, %13 : vector<16x128xf32>
    %cst_11 = arith.constant 6.000000e+00 : f32
    %15 = vector.broadcast %cst_11 : f32 to vector<16x128xf32>
    %16 = arith.addf %0, %15 : vector<16x128xf32>
    %17 = arith.minimumf %14, %16 : vector<16x128xf32>
    %18 = arith.truncf %17 : vector<16x128xf32> to vector<16x128xbf16>
    %c0_12 = arith.constant 0 : index
    %c0_13 = arith.constant 0 : index
    %19 = vector.load %arg6[%c0_12, %c0_13] : memref<128x128xbf16, #tpu.memory_space<vmem>>, vector<128x128xbf16>
    %cst_14 = arith.constant dense<0.000000e+00> : vector<16x128xf32>
    %20 = tpu.matmul %18, %19, %cst_14 {dimension_numbers = #tpu.dot_dimension_numbers<[1], [0], [0], [1], [0, 0, 1, 1], [], []>} : vector<16x128xbf16>, vector<128x128xbf16>, vector<16x128xf32> -> vector<16x128xf32>
    %c0_15 = arith.constant 0 : index
    %c0_16 = arith.constant 0 : index
    %21 = vector.load %arg7[%c0_15, %c0_16] : memref<1x128xf32, #tpu.memory_space<vmem>>, vector<1x128xf32>
    %22 = vector.broadcast %21 : vector<1x128xf32> to vector<16x128xf32>
    %23 = arith.addf %20, %22 : vector<16x128xf32>
    %cst_17 = arith.constant 0.000000e+00 : f32
    %24 = vector.broadcast %cst_17 : f32 to vector<16x128xf32>
    %25 = arith.maximumf %23, %24 : vector<16x128xf32>
    %26 = arith.truncf %25 : vector<16x128xf32> to vector<16x128xbf16>
    %c0_18 = arith.constant 0 : index
    %c0_19 = arith.constant 0 : index
    %27 = vector.load %arg8[%c0_18, %c0_19] : memref<128x128xbf16, #tpu.memory_space<vmem>>, vector<128x128xbf16>
    %cst_20 = arith.constant dense<0.000000e+00> : vector<16x128xf32>
    %28 = tpu.matmul %26, %27, %cst_20 {dimension_numbers = #tpu.dot_dimension_numbers<[1], [0], [0], [1], [0, 0, 1, 1], [], []>} : vector<16x128xbf16>, vector<128x128xbf16>, vector<16x128xf32> -> vector<16x128xf32>
    %c0_21 = arith.constant 0 : index
    %c0_22 = arith.constant 0 : index
    %29 = vector.load %arg9[%c0_21, %c0_22] : memref<1x128xf32, #tpu.memory_space<vmem>>, vector<1x128xf32>
    %30 = vector.broadcast %29 : vector<1x128xf32> to vector<16x128xf32>
    %31 = arith.addf %28, %30 : vector<16x128xf32>
    %c0_23 = arith.constant 0 : index
    %c0_24 = arith.constant 0 : index
    %32 = vector.load %arg10[%c0_23, %c0_24] : memref<16x128xf32, #tpu.memory_space<vmem>>, vector<16x128xf32>
    tpu.vector_store %arg10[%c0_23, %c0_24], %31 {strides = array<i32>} : memref<16x128xf32, #tpu.memory_space<vmem>>, vector<16x128xf32>,
    return
  }
  func.func @transform_0(%arg0: i32) -> (i32, i32) {
    %c0_i32 = arith.constant 0 : i32
    %c0_i32_0 = arith.constant 0 : i32
    return %arg0, %c0_i32 : i32, i32
  }
  func.func @transform_1(%arg0: i32) -> (i32, i32) {
    %c0_i32 = arith.constant 0 : i32
    %c0_i32_0 = arith.constant 0 : i32
    %c0_i32_1 = arith.constant 0 : i32
    return %c0_i32, %c0_i32_0 : i32, i32
  }
  func.func @transform_2(%arg0: i32) -> (i32, i32) {
    %c0_i32 = arith.constant 0 : i32
    %c0_i32_0 = arith.constant 0 : i32
    %c0_i32_1 = arith.constant 0 : i32
    return %c0_i32, %c0_i32_0 : i32, i32
  }
  func.func @transform_3(%arg0: i32) -> (i32, i32) {
    %c0_i32 = arith.constant 0 : i32
    %c0_i32_0 = arith.constant 0 : i32
    %c0_i32_1 = arith.constant 0 : i32
    return %c0_i32, %c0_i32_0 : i32, i32
  }
  func.func @transform_4(%arg0: i32) -> (i32, i32) {
    %c0_i32 = arith.constant 0 : i32
    %c0_i32_0 = arith.constant 0 : i32
    %c0_i32_1 = arith.constant 0 : i32
    return %c0_i32, %c0_i32_0 : i32, i32
  }
  func.func @transform_5(%arg0: i32) -> (i32, i32) {
    %c0_i32 = arith.constant 0 : i32
    %c0_i32_0 = arith.constant 0 : i32
    %c0_i32_1 = arith.constant 0 : i32
    return %c0_i32, %c0_i32_0 : i32, i32
  }
  func.func @transform_6(%arg0: i32) -> (i32, i32) {
    %c0_i32 = arith.constant 0 : i32
    %c0_i32_0 = arith.constant 0 : i32
    %c0_i32_1 = arith.constant 0 : i32
    return %c0_i32, %c0_i32_0 : i32, i32
  }
  func.func @transform_7(%arg0: i32) -> (i32, i32) {
    %c0_i32 = arith.constant 0 : i32
    %c0_i32_0 = arith.constant 0 : i32
    %c0_i32_1 = arith.constant 0 : i32
    return %c0_i32, %c0_i32_0 : i32, i32
  }
  func.func @transform_8(%arg0: i32) -> (i32, i32) {
    %c0_i32 = arith.constant 0 : i32
    %c0_i32_0 = arith.constant 0 : i32
    %c0_i32_1 = arith.constant 0 : i32
    return %c0_i32, %c0_i32_0 : i32, i32
  }
  func.func @transform_9(%arg0: i32) -> (i32, i32) {
    %c0_i32 = arith.constant 0 : i32
    %c0_i32_0 = arith.constant 0 : i32
    return %arg0, %c0_i32 : i32, i32
  }
}

module attributes {stable_mosaic.version = 11 : i64} {
  func.func @autoencoder_kernel(%arg0: i32, %arg1: memref<16x128xf32, #tpu.memory_space<vmem>>, %arg2: memref<128x128xbf16, #tpu.memory_space<vmem>>, %arg3: memref<1x128xf32, #tpu.memory_space<vmem>>, %arg4: memref<1x128xf32, #tpu.memory_space<vmem>>, %arg5: memref<128x128xbf16, #tpu.memory_space<vmem>>, %arg6: memref<128x128xbf16, #tpu.memory_space<vmem>>, %arg7: memref<1x128xf32, #tpu.memory_space<vmem>>, %arg8: memref<128x128xbf16, #tpu.memory_space<vmem>>, %arg9: memref<1x128xf32, #tpu.memory_space<vmem>>, %arg10: memref<16x128xf32, #tpu.memory_space<vmem>>) attributes {dimension_semantics = [#tpu.dimension_semantics<parallel>], iteration_bounds = array<i64: 2>, scalar_prefetch = 0 : i64, scratch_operands = 0 : i64, tpu.core_type = #tpu.core_type<tc>, window_params = [{transform_indices = @transform_0, window_bounds = array<i64: 16, 128>}, {pipeline_mode = #tpu.pipeline_mode<synchronous>, transform_indices = @transform_1, window_bounds = array<i64: 128, 128>}, {pipeline_mode = #tpu.pipeline_mode<synchronous>, transform_indices = @transform_2, window_bounds = array<i64: 1, 128>}, {pipeline_mode = #tpu.pipeline_mode<synchronous>, transform_indices = @transform_3, window_bounds = array<i64: 1, 128>}, {pipeline_mode = #tpu.pipeline_mode<synchronous>, transform_indices = @transform_4, window_bounds = array<i64: 128, 128>}, {pipeline_mode = #tpu.pipeline_mode<synchronous>, transform_indices = @transform_5, window_bounds = array<i64: 128, 128>}, {pipeline_mode = #tpu.pipeline_mode<synchronous>, transform_indices = @transform_6, window_bounds = array<i64: 1, 128>}, {pipeline_mode = #tpu.pipeline_mode<synchronous>, transform_indices = @transform_7, window_bounds = array<i64: 128, 128>}, {pipeline_mode = #tpu.pipeline_mode<synchronous>, transform_indices = @transform_8, window_bounds = array<i64: 1, 128>}, {transform_indices = @transform_9, window_bounds = array<i64: 16, 128>}]} {
    %c0 = arith.constant 0 : index
    %c0_0 = arith.constant 0 : index
    %0 = vector.load %arg1[%c0, %c0_0] : memref<16x128xf32, #tpu.memory_space<vmem>>, vector<16x128xf32>
    %1 = arith.truncf %0 : vector<16x128xf32> to vector<16x128xbf16>
    %c0_1 = arith.constant 0 : index
    %c0_2 = arith.constant 0 : index
    %2 = vector.load %arg2[%c0_1, %c0_2] : memref<128x128xbf16, #tpu.memory_space<vmem>>, vector<128x128xbf16>
    %cst = arith.constant dense<0.000000e+00> : vector<16x128xf32>
    %3 = tpu.matmul %1, %2, %cst {dimension_numbers = #tpu.dot_dimension_numbers<[1], [0], [0], [1], [0, 0, 1, 1], [], []>} : vector<16x128xbf16>, vector<128x128xbf16>, vector<16x128xf32> -> vector<16x128xf32>
    %c0_3 = arith.constant 0 : index
    %c0_4 = arith.constant 0 : index
    %4 = vector.load %arg3[%c0_3, %c0_4] : memref<1x128xf32, #tpu.memory_space<vmem>>, vector<1x128xf32>
    %5 = vector.broadcast %4 : vector<1x128xf32> to vector<16x128xf32>
    %6 = arith.addf %3, %5 : vector<16x128xf32>
    %cst_5 = arith.constant 0.000000e+00 : f32
    %7 = vector.broadcast %cst_5 : f32 to vector<16x128xf32>
    %8 = arith.maximumf %6, %7 : vector<16x128xf32>
    %9 = arith.truncf %8 : vector<16x128xf32> to vector<16x128xbf16>
    %c0_6 = arith.constant 0 : index
    %c0_7 = arith.constant 0 : index
    %10 = vector.load %arg5[%c0_6, %c0_7] : memref<128x128xbf16, #tpu.memory_space<vmem>>, vector<128x128xbf16>
    %cst_8 = arith.constant dense<0.000000e+00> : vector<16x128xf32>
    %11 = tpu.matmul %9, %10, %cst_8 {dimension_numbers = #tpu.dot_dimension_numbers<[1], [0], [0], [1], [0, 0, 1, 1], [], []>} : vector<16x128xbf16>, vector<128x128xbf16>, vector<16x128xf32> -> vector<16x128xf32>
    %c0_9 = arith.constant 0 : index
    %c0_10 = arith.constant 0 : index
    %12 = vector.load %arg4[%c0_9, %c0_10] : memref<1x128xf32, #tpu.memory_space<vmem>>, vector<1x128xf32>
    %13 = vector.broadcast %12 : vector<1x128xf32> to vector<16x128xf32>
    %14 = arith.addf %11, %13 : vector<16x128xf32>
    %cst_11 = arith.constant 6.000000e+00 : f32
    %15 = vector.broadcast %cst_11 : f32 to vector<16x128xf32>
    %16 = arith.addf %0, %15 : vector<16x128xf32>
    %17 = arith.minimumf %14, %16 : vector<16x128xf32>
    %18 = arith.truncf %17 : vector<16x128xf32> to vector<16x128xbf16>
    %c0_12 = arith.constant 0 : index
    %c0_13 = arith.constant 0 : index
    %19 = vector.load %arg6[%c0_12, %c0_13] : memref<128x128xbf16, #tpu.memory_space<vmem>>, vector<128x128xbf16>
    %cst_14 = arith.constant dense<0.000000e+00> : vector<16x128xf32>
    %20 = tpu.matmul %18, %19, %cst_14 {dimension_numbers = #tpu.dot_dimension_numbers<[1], [0], [0], [1], [0, 0, 1, 1], [], []>} : vector<16x128xbf16>, vector<128x128xbf16>, vector<16x128xf32> -> vector<16x128xf32>
    %c0_15 = arith.constant 0 : index
    %c0_16 = arith.constant 0 : index
    %21 = vector.load %arg7[%c0_15, %c0_16] : memref<1x128xf32, #tpu.memory_space<vmem>>, vector<1x128xf32>
    %22 = vector.broadcast %21 : vector<1x128xf32> to vector<16x128xf32>
    %23 = arith.addf %20, %22 : vector<16x128xf32>
    %cst_17 = arith.constant 0.000000e+00 : f32
    %24 = vector.broadcast %cst_17 : f32 to vector<16x128xf32>
    %25 = arith.maximumf %23, %24 : vector<16x128xf32>
    %26 = arith.truncf %25 : vector<16x128xf32> to vector<16x128xbf16>
    %c0_18 = arith.constant 0 : index
    %c0_19 = arith.constant 0 : index
    %27 = vector.load %arg8[%c0_18, %c0_19] : memref<128x128xbf16, #tpu.memory_space<vmem>>, vector<128x128xbf16>
    %cst_20 = arith.constant dense<0.000000e+00> : vector<16x128xf32>
    %28 = tpu.matmul %26, %27, %cst_20 {dimension_numbers = #tpu.dot_dimension_numbers<[1], [0], [0], [1], [0, 0, 1, 1], [], []>} : vector<16x128xbf16>, vector<128x128xbf16>, vector<16x128xf32> -> vector<16x128xf32>
    %c0_21 = arith.constant 0 : index
    %c0_22 = arith.constant 0 : index
    %29 = vector.load %arg9[%c0_21, %c0_22] : memref<1x128xf32, #tpu.memory_space<vmem>>, vector<1x128xf32>
    %30 = vector.broadcast %29 : vector<1x128xf32> to vector<16x128xf32>
    %31 = arith.addf %28, %30 : vector<16x128xf32>
    %c0_23 = arith.constant 0 : index
    %c0_24 = arith.constant 0 : index
    %32 = vector.load %arg10[%c0_23, %c0_24] : memref<16x128xf32, #tpu.memory_space<vmem>>, vector<16x128xf32>
    tpu.vector_store %arg10[%c0_23, %c0_24], %31 {strides = array<i32>} : memref<16x128xf32, #tpu.memory_space<vmem>>, vector<16x128xf32>,
    return
  }
  func.func @transform_0(%arg0: i32) -> (i32, i32) {
    %c0_i32 = arith.constant 0 : i32
    %c0_i32_0 = arith.constant 0 : i32
    return %arg0, %c0_i32 : i32, i32
  }
  func.func @transform_1(%arg0: i32) -> (i32, i32) {
    %c0_i32 = arith.constant 0 : i32
    %c0_i32_0 = arith.constant 0 : i32
    %c0_i32_1 = arith.constant 0 : i32
    return %c0_i32, %c0_i32_0 : i32, i32
  }
  func.func @transform_2(%arg0: i32) -> (i32, i32) {
    %c0_i32 = arith.constant 0 : i32
    %c0_i32_0 = arith.constant 0 : i32
    %c0_i32_1 = arith.constant 0 : i32
    return %c0_i32, %c0_i32_0 : i32, i32
  }
  func.func @transform_3(%arg0: i32) -> (i32, i32) {
    %c0_i32 = arith.constant 0 : i32
    %c0_i32_0 = arith.constant 0 : i32
    %c0_i32_1 = arith.constant 0 : i32
    return %c0_i32, %c0_i32_0 : i32, i32
  }
  func.func @transform_4(%arg0: i32) -> (i32, i32) {
    %c0_i32 = arith.constant 0 : i32
    %c0_i32_0 = arith.constant 0 : i32
    %c0_i32_1 = arith.constant 0 : i32
    return %c0_i32, %c0_i32_0 : i32, i32
  }
  func.func @transform_5(%arg0: i32) -> (i32, i32) {
    %c0_i32 = arith.constant 0 : i32
    %c0_i32_0 = arith.constant 0 : i32
    %c0_i32_1 = arith.constant 0 : i32
    return %c0_i32, %c0_i32_0 : i32, i32
  }
  func.func @transform_6(%arg0: i32) -> (i32, i32) {
    %c0_i32 = arith.constant 0 : i32
    %c0_i32_0 = arith.constant 0 : i32
    %c0_i32_1 = arith.constant 0 : i32
    return %c0_i32, %c0_i32_0 : i32, i32
  }
  func.func @transform_7(%arg0: i32) -> (i32, i32) {
    %c0_i32 = arith.constant 0 : i32
    %c0_i32_0 = arith.constant 0 : i32
    %c0_i32_1 = arith.constant 0 : i32
    return %c0_i32, %c0_i32_0 : i32, i32
  }
  func.func @transform_8(%arg0: i32) -> (i32, i32) {
    %c0_i32 = arith.constant 0 : i32
    %c0_i32_0 = arith.constant 0 : i32
    %c0_i32_1 = arith.constant 0 : i32
    return %c0_i32, %c0_i32_0 : i32, i32
  }
  func.func @transform_9(%arg0: i32) -> (i32, i32) {
    %c0_i32 = arith.constant 0 : i32
    %c0_i32_0 = arith.constant 0 : i32
    return %arg0, %c0_i32 : i32, i32
  }
}

</mosaic_0001>

<bundles_post_ra>
// kernel: tpu_custom_call.1
= control target key start
LH: loop header
LB: loop body
LE: loop exit
PB: predicated region body
PF: predicated region fallthrough
CT: control target
= control target key end

     0   :  { %s1943_s0 = inlined_call_operand.hbm [shape: f32[32,128], index: 0, kind: input, shape index: {}]   ;;  %s1944_s1 = inlined_call_operand.hbm [shape: bf16[128,128], index: 1, kind: input, shape index: {}]   ;;  %s1945_s2 = inlined_call_operand.vmem [shape: f32[1,128], index: 2, kind: input, shape index: {}]   ;;  %s1946_s3 = inlined_call_operand.vmem [shape: f32[1,128], index: 3, kind: input, shape index: {}]   ;;  %s1947_s4 = inlined_call_operand.hbm [shape: bf16[128,128], index: 4, kind: input, shape index: {}]   ;;  %s1948_s5 = inlined_call_operand.hbm [shape: bf16[128,128], index: 5, kind: input, shape index: {}]   ;;  %s1949_s6 = inlined_call_operand.vmem [shape: f32[1,128], index: 6, kind: input, shape index: {}]   ;;  %s1950_s7 = inlined_call_operand.hbm [shape: bf16[128,128], index: 7, kind: input, shape index: {}]   ;;  %s1951_s8 = inlined_call_operand.vmem [shape: f32[1,128], index: 8, kind: input, shape index: {}]   ;;  %s1952_s9 = inlined_call_operand.hbm [shape: f32[32,128], index: 9, kind: output, shape index: {}]  }
   0x1   :  { %1959 = sst [smem:[#allocation18_spill]] %s1952_s9 }
   0x2   :  { %14 = vsyncpa [#allocation3], 0 }
   0x3   :  { %16 = vsyncpa [#allocation3 + $0x1], 0 }
   0x4   :  { %17 = vsyncpa [#allocation6], 0 }
   0x5   :  { %18 = vsyncpa [#allocation9], 0 }
   0x6   :  { %19 = vsyncpa [#allocation4], 0 }
   0x7   :  { %21 = vsyncpa [#allocation4 + $0x1], 0  ;;  %s1586_s30 = smov 0   ;;  %s1588_s10 = smov 0  }
   0x8   :  { %s1590_s11 = smov 0   ;;  %s1592_s12 = smov 0  }
   0x9 LB: > { %1960 = sst [smem:[#allocation16_spill]] %s1508_s30  ;;  %s1607_s13 = sadd.s32 4294967295, %s1520_s12   ;;  %s1520_s12 = sphi %s1592_s12, %s1984_s12   ;;  %s1516_s11 = sphi %s1590_s11, %s1983_s11   ;;  %s1512_s10 = sphi %s1588_s10, %s1982_s10   ;;  %s1508_s30 = sphi %s1586_s30, %s1981_s30  }
   0xa   : > { %s1001_s14 = sadd.s32 4294967294, %s1520_s12   ;;  %p47_p0 = scmp.ne.s32.totalorder %s1512_s10, %s1508_s30 }
   0xb   : > { %p1953_p1 = scmp.eq.s32.totalorder %s1607_s13, 0  ;;  %p245_p3 = scmp.eq.s32.totalorder %s1001_s14, 1 }
   0xc   : > { %p1002_p5 = scmp.ge.s32.totalorder %s1520_s12, 1  ;;  %p252_p7 = scmp.lt.s32.totalorder %s1520_s12, 3 }
   0xd   : > { %p1616_p4 = por %p1953_p1, %p47_p0  ;;  %p1621_p6 = por %p245_p3, %p47_p0 }
   0xe   : > { %p1626_p8 = pnand %p1002_p5, %p252_p7  ;;  %s1522_s18 = smov [#allocation5]  }
   0xf   : > { %s1961_s15 = scalar_select %p1616_p4, 1, 0 }
  0x10   : > { %s1962_s16 = scalar_select %p1621_p6, 1, 0 }
  0x11   : > { %s1964_s17 = scalar_select %p1626_p8, 1, 0 }
  0x12   : > { %1963 = sst [smem:[#allocation17_spill]] %s1962_s16  ;;  %s264_s19 = sshll.u32 %s1522_s18, 4  ;;  %s1630_s19 = int_to_ptr.vmem [resolvable:$true] %s264_s19 }
  0x13   : > { %p1197_p9 = pneg %p1626_p8  ;;  %s1523_s21 = smov [#allocation8]  }
  0x14   : > { %s296_s22 = sshll.u32 %s1523_s21, 4  ;;  %s1524_s23 = smov [#allocation7]   ;;  %s1641_s22 = int_to_ptr.vmem [resolvable:$true] %s296_s22 }
  0x15   : > { %p1637_p11 = pnand %p1197_p9, %p1953_p1  ;;  %s1643_s24 = sshll.u32 %s1524_s23, 4  ;;  %s284_s24 = int_to_ptr.vmem [resolvable:$true] %s1643_s24 }
  0x16   : > { %s1304_s27 = scalar_lea.hbm %s1944_s1, 1024 }
  0x17   : > { %p1305_p12 = scmp.ne.s32.totalorder %s1944_s1, %s1304_s27  ;;  %p1653_p13 = pneg %p1637_p11 }
  0x18   : > { %p1311_p5 = scmp.lt.u32.totalorder %s1304_s27, %s1944_s1 }
  0x19   : > { %p1307_p0 = pnand %p1653_p13, %p1305_p12 }
  0x1b   : > { %p1308_p3 = pneg %p1307_p0 }
  0x1d   : > { %p1313_p7 = pnand %p1311_p5, %p1308_p3 }
  0x1f   : > { %1316 = shalt.err (!%p1313_p7)
}
  0x20   : > { %s1317_s23 = scalar_lea.vmem %s1630_s19, 1024  ;;  %p1325_p2 = scmp.lt.s32.totalorder %s1630_s19, %s1630_s19 }
  0x21   : > { %p1318_p9 = scmp.ne.s32.totalorder %s1630_s19, %s1317_s23  ;;  %p1326_p6 = scmp.lt.s32.totalorder %s1317_s23, %s1317_s23 }
  0x23   : > { %p1320_p10 = pnand %p1318_p9, %p1653_p13  ;;  %p1327_p12 = por %p1326_p6, %p1325_p2 }
  0x25   : > { %p1321_p1 = pneg %p1320_p10 }
  0x27   : > { %p1328_p0 = pnand %p1327_p12, %p1321_p1 }
  0x29   : > { %1331 = shalt.err (!%p1328_p0)
}
  0x2a   : > { %s1525_s25 = smov 64   ;;  %s1526_s26 = smov 4  }
  0x2b   : > { %1200 = dma.hbm_to_vmem [thread:$0]  (!%p1637_p11), %s1944_s1, 1024, %s1630_s19, [#allocation6], %s1525_s25, %s1525_s25, %s1526_s26  }
  0x2c   : > { %s1332_s21 = scalar_lea.hbm %s1948_s5, 1024 }
  0x2d   : > { %p1333_p1 = scmp.ne.s32.totalorder %s1948_s5, %s1332_s21  ;;  %p1339_p10 = scmp.lt.u32.totalorder %s1332_s21, %s1948_s5 }
  0x2f   : > { %p1335_p2 = pnand %p1333_p1, %p1653_p13 }
  0x31   : > { %p1336_p6 = pneg %p1335_p2 }
  0x33   : > { %p1341_p3 = pnand %p1339_p10, %p1336_p6 }
  0x35   : > { %1344 = shalt.err (!%p1341_p3)
}
  0x36   : > { %s1345_s19 = scalar_lea.vmem %s1641_s22, 1024  ;;  %p1353_p12 = scmp.lt.s32.totalorder %s1641_s22, %s1641_s22 }
  0x37   : > { %p1346_p5 = scmp.ne.s32.totalorder %s1641_s22, %s1345_s19  ;;  %p1354_p0 = scmp.lt.s32.totalorder %s1345_s19, %s1345_s19 }
  0x39   : > { %p1348_p7 = pnand %p1346_p5, %p1653_p13  ;;  %p1355_p1 = por %p1354_p0, %p1353_p12 }
  0x3b   : > { %p1349_p9 = pneg %p1348_p7 }
  0x3d   : > { %p1356_p2 = pnand %p1355_p1, %p1349_p9 }
  0x3f   : > { %1359 = shalt.err (!%p1356_p2)
}
  0x40   : > { %1206 = dma.hbm_to_vmem [thread:$0]  (!%p1637_p11), %s1948_s5, 1024, %s1641_s22, [#allocation9], %s1525_s25, %s1525_s25, %s1526_s26  }
  0x41   : > { %s1360_s28 = scalar_lea.hbm %s1947_s4, 1024 }
  0x42   : > { %p1361_p6 = scmp.ne.s32.totalorder %s1947_s4, %s1360_s28  ;;  %p1367_p5 = scmp.lt.u32.totalorder %s1360_s28, %s1947_s4 }
  0x44   : > { %p1363_p10 = pnand %p1361_p6, %p1653_p13 }
  0x46   : > { %p1364_p3 = pneg %p1363_p10 }
  0x48   : > { %p1369_p7 = pnand %p1367_p5, %p1364_p3 }
  0x4a   : > { %1372 = shalt.err (!%p1369_p7)
}
  0x4b   : > { %s1373_s19 = scalar_lea.vmem %s284_s24, 1024  ;;  %p1381_p1 = scmp.lt.s32.totalorder %s284_s24, %s284_s24 }
  0x4c   : > { %p1374_p9 = scmp.ne.s32.totalorder %s284_s24, %s1373_s19  ;;  %p1382_p2 = scmp.lt.s32.totalorder %s1373_s19, %s1373_s19 }
  0x4e   : > { %p1376_p12 = pnand %p1374_p9, %p1653_p13  ;;  %p1383_p4 = por %p1382_p2, %p1381_p1 }
  0x50   : > { %p1377_p0 = pneg %p1376_p12 }
  0x52   : > { %p1384_p8 = pnand %p1383_p4, %p1377_p0 }
  0x54   : > { %1387 = shalt.err (!%p1384_p8)
}
  0x55   : > { %1203 = dma.hbm_to_vmem [thread:$0]  (!%p1637_p11), %s1947_s4, 1024, %s284_s24, [#allocation6], %s1525_s25, %s1525_s25, %s1526_s26  }
  0x56   : > { %s1527_s30 = smov [#allocation10]   ;;  %s1388_s29 = scalar_lea.hbm %s1950_s7, 1024 }
  0x57   : > { %s312_s16 = sshll.u32 %s1527_s30, 4  ;;  %p1389_p4 = scmp.ne.s32.totalorder %s1950_s7, %s1388_s29  ;;  %s313_s16 = int_to_ptr.vmem [resolvable:$true] %s312_s16 }
  0x58   : > { %p1395_p10 = scmp.lt.u32.totalorder %s1388_s29, %s1950_s7 }
  0x59   : > { %p1391_p8 = pnand %p1389_p4, %p1653_p13 }
  0x5b   : > { %p1392_p6 = pneg %p1391_p8 }
  0x5d   : > { %p1397_p3 = pnand %p1395_p10, %p1392_p6 }
  0x5f   : > { %1400 = shalt.err (!%p1397_p3)
}
  0x60   : > { %s1401_s24 = scalar_lea.vmem %s313_s16, 1024  ;;  %p1409_p12 = scmp.lt.s32.totalorder %s313_s16, %s313_s16 }
  0x61   : > { %p1402_p5 = scmp.ne.s32.totalorder %s313_s16, %s1401_s24  ;;  %p1410_p0 = scmp.lt.s32.totalorder %s1401_s24, %s1401_s24 }
  0x63   : > { %p1404_p7 = pnand %p1402_p5, %p1653_p13  ;;  %p1411_p1 = por %p1410_p0, %p1409_p12 }
  0x65   : > { %p1405_p9 = pneg %p1404_p7 }
  0x67   : > { %p1412_p2 = pnand %p1411_p1, %p1405_p9 }
  0x69   : > { %1415 = shalt.err (!%p1412_p2)
}
  0x6a   : > { %1209 = dma.hbm_to_vmem [thread:$0]  (!%p1637_p11), %s1950_s7, 1024, %s313_s16, [#allocation9], %s1525_s25, %s1525_s25, %s1526_s26  }
  0x6b   : > { %s1747_s14 = sadd.s32 1, %s1520_s12   ;;  %s34_s20 = sadd.s32 1, %s1516_s11 }
  0x6c   : > { %s31_s30 = ssub.s32 %s1520_s12, %s1747_s14  ;;  %p41_p13 = scmp.ne.s32.totalorder %s1516_s11, %s1512_s10 }
  0x6d   : > { %p32_p4 = scmp.eq.s32.totalorder %s31_s30, 0  ;;  %p42_p8 = scmp.eq.s32.totalorder %s1520_s12, 0 }
  0x6e   : > { %p1967_p6 = scmp.eq.s32.totalorder %s1607_s13, 1  ;;  %p1222_p3 = scmp.lt.s32.totalorder %s1520_s12, 2 }
  0x6f   : > { %s1763_s28 = scalar_select %p32_p4, %s1516_s11, %s34_s20  }
  0x70   : > { %p1757_p10 = por %p1967_p6, %p41_p13  ;;  %p43_p5 = por %p42_p8, %p41_p13 }
  0x71   : > { %s329_s29 = sand.u32 1, %s1516_s11   ;;  %s1059_s25 = sshll.u32 %s1520_s12, 8 }
  0x72   : > { %s1008_s18 = sshll.u32 %s329_s29, 4  ;;  %s1770_s21 = scalar_lea.hbm %s1943_s0, %s1059_s25 }
  0x73   : > { %s333_s23 = scalar_lea.vmem [#allocation2], %s1008_s18  ;;  %p1774_p11 = pnand %p1222_p3, %p43_p5 }
  0x74   : > { %s340_s19 = sshll.u32 %s333_s23, 4  ;;  %s1778_s22 = scalar_lea.sflag [#allocation3], %s329_s29  ;;  %s1772_s19 = int_to_ptr.vmem [resolvable:$true] %s340_s19 }
  0x75   : > { %s1416_s9 = scalar_lea.hbm %s1770_s21, 256  ;;  %p1418_p9 = pneg %p1774_p11 }
  0x76   : > { %p1417_p7 = scmp.ne.s32.totalorder %s1770_s21, %s1416_s9  ;;  %s1421_s18 = scalar_lea.hbm %s1943_s0, 512 }
  0x77   : > { %p1422_p1 = scmp.lt.u32.totalorder %s1770_s21, %s1943_s0  ;;  %p1423_p2 = scmp.lt.u32.totalorder %s1421_s18, %s1416_s9 }
  0x78   : > { %p1419_p12 = pnand %p1418_p9, %p1417_p7  ;;  %p1425_p4 = scmp.lt.u32.totalorder %s1416_s9, %s1770_s21 }
  0x79   : > { %p1424_p13 = por %p1423_p2, %p1422_p1 }
  0x7a   : > { %p1420_p0 = pneg %p1419_p12 }
  0x7b   : > { %p1426_p8 = por %p1425_p4, %p1424_p13 }
  0x7d   : > { %p1427_p6 = pnand %p1426_p8, %p1420_p0 }
  0x7f   : > { %1430 = shalt.err (!%p1427_p6)
}
  0x80   : > { %s1431_s29 = scalar_lea.vmem %s1772_s19, 256  ;;  %s1528_s16 = smov [#allocation2]  }
  0x81   : > { %p1432_p3 = scmp.ne.s32.totalorder %s1772_s19, %s1431_s29  ;;  %s1436_s23 = sshll.u32 %s1528_s16, 4  ;;  %s1437_s23 = int_to_ptr.vmem [resolvable:$false] %s1436_s23 }
  0x82   : > { %s1438_s20 = scalar_lea.vmem %s1437_s23, 512  ;;  %p1439_p12 = scmp.lt.s32.totalorder %s1772_s19, %s1437_s23 }
  0x83   : > { %p1434_p5 = pnand %p1432_p3, %p1418_p9  ;;  %p1440_p1 = scmp.lt.s32.totalorder %s1438_s20, %s1431_s29 }
  0x85   : > { %p1435_p7 = pneg %p1434_p5  ;;  %p1441_p2 = por %p1440_p1, %p1439_p12 }
  0x87   : > { %p1442_p13 = pnand %p1441_p2, %p1435_p7 }
  0x89   : > { %1445 = shalt.err (!%p1442_p13)
}
  0x8a   : > { %s1529_s9 = smov 128   ;;  %s1530_s30 = smov 8  }
  0x8b   : > { %1213 = dma.hbm_to_vmem [thread:$0]  (!%p1774_p11), %s1770_s21, 256, %s1772_s19, %s1778_s22, %s1529_s9, %s1529_s9, %s1530_s30  }
  0x8c   : > { %p1970_p9 = scmp.ne.s32.totalorder %s1964_s17, 0 }
  0x8d   : > { %s1809_s18 = sand.u32 (!%p1970_p9), 1, %s1512_s10   ;;  %p1971_p0 = scmp.ne.s32.totalorder (!%p1970_p9), %s1961_s15, 0 }
  0x8e   : > { %352 = sbr.rel (%p1970_p9) target bundleno = 1082 (0x43a), region = 56  ;;  %s1012_s25 = sshll.u32 (!%p1970_p9), %s1809_s18, 4 }
  0x8f   : > { %s355_s26 = scalar_lea.sflag (!%p1970_p9), [#allocation3], %s1809_s18  ;;  %s1815_s29 = scalar_lea.vmem (!%p1970_p9), [#allocation2], %s1012_s25 }
  0x95   : > { %1491 = dma.done.wait (%p1971_p0), %s355_s26, 256  }
  0x96   : > { %1493 = vsyncadd (%p1971_p0), %s355_s26, 4294967040  ;;  %p1972_p11 = scmp.eq.s32.totalorder %s1607_s13, 0 }
  0x98   : > { %1495 = dma.done.wait (%p1972_p11), [#allocation6], 2048   ;;  %p1973_p4 = pmov %p1972_p11 }
  0x9a   : > { %1497 = vsyncadd (%p1973_p4), [#allocation6], 4294965248  ;;  %p1974_p8 = pmov %p1973_p4 }
  0x9b   : > { %p1975_p6 = pmov %p1973_p4 }
  0x9c   : > { %1499 = dma.done.wait (%p1974_p8), [#allocation9], 2048  }
  0x9d   : > { %1501 = vsyncadd (%p1975_p6), [#allocation9], 4294965248  ;;  %v1531_v0 = vmov 0.0   ;;  %vm1532_vm0 = vmmov 0   ;;  %v1272_v1 = vld [vmem:[#allocation5] sm:$0xff]   ;;  %v1273_v2 = vld [vmem:[#allocation5 + $0x8] sm:$0xff]  }
  0x9e   : > { %1097 = vmatprep.subr.bf16.mxu0 %v1531_v0  ;;  %1113 = vmatprep.mubr.msk.bf16.mxu0 %vm1532_vm0, %v1531_v0  ;;  %v1274_v3 = vld [vmem:[#allocation5 + $0x10] sm:$0xff]   ;;  %v1280_v4 = vld [vmem:[#allocation7] sm:$0xff]   ;;  %v1275_v5 = vld [vmem:[#allocation5 + $0x18] sm:$0xff]   ;;  %s408_s20 = scalar_lea.vmem [#allocation11], %s1012_s25  ;;  %s1060_s30 = sshll.u32 %s1607_s13, 8 }
  0x9f   : > { %1117 = vmatprep.subr.bf16.mxu1 %v1531_v0  ;;  %1133 = vmatprep.mubr.msk.bf16.mxu1 %vm1532_vm0, %v1531_v0  ;;  %v1281_v6 = vld [vmem:[#allocation7 + $0x8] sm:$0xff]   ;;  %v1276_v7 = vld [vmem:[#allocation5 + $0x20] sm:$0xff]   ;;  %v1282_v8 = vld [vmem:[#allocation7 + $0x10] sm:$0xff]   ;;  %s890_s9 = sshll.u32 %s408_s20, 4  ;;  %s1976_s15 = sld [smem:[#allocation18_spill]]  ;;  %s1894_s9 = int_to_ptr.vmem [resolvable:$true] %s890_s9 }
  0xa0   : > { %1098 = vmatpush3.bf16.msra.mxu0 %v1272_v1  ;;  %1118 = vmatpush3.bf16.msra.mxu1 %v1280_v4  ;;  %v1277_v9 = vld [vmem:[#allocation5 + $0x28] sm:$0xff]   ;;  %v1283_v10 = vld [vmem:[#allocation7 + $0x18] sm:$0xff]   ;;  %v1278_v11 = vld [vmem:[#allocation5 + $0x30] sm:$0xff]   ;;  %s877_s25 = scalar_lea.sflag [#allocation4], %s1809_s18  ;;  %s1446_s13 = scalar_lea.vmem %s1894_s9, 256 }
  0xa1   : > { %1099 = vmatprep.subr.bf16.mxu0 %v1531_v0  ;;  %1119 = vmatprep.subr.bf16.mxu1 %v1531_v0  ;;  %v1284_v12 = vld [vmem:[#allocation7 + $0x20] sm:$0xff]   ;;  %v1279_v13 = vld [vmem:[#allocation5 + $0x38] sm:$0xff]   ;;  %v1285_v16 = vld [vmem:[#allocation7 + $0x28] sm:$0xff]   ;;  %p1447_p3 = scmp.ne.s32.totalorder %s1894_s9, %s1446_s13  ;;  %s1533_s21 = smov [#allocation11]  }
  0xa2   : > { %v1845_v14 = vld [vmem:[%s1815_s29] sm:$0xff]  ;;  %v1848_v15 = vld [vmem:[%s1815_s29 + $0x8] sm:$0xff]  ;;  %s1450_s19 = sshll.u32 %s1533_s21, 4  ;;  %s1451_s19 = int_to_ptr.vmem [resolvable:$false] %s1450_s19 }
  0xa3   : > { %v414_v17 = vpack.c.bf16 %v1848_v15, %v1845_v14  ;;  %v1286_v18 = vld [vmem:[#allocation7 + $0x30] sm:$0xff]   ;;  %v1287_v19 = vld [vmem:[#allocation7 + $0x38] sm:$0xff]   ;;  %v1288_v20 = vld [vmem:[#allocation8] sm:$0xff]   ;;  %v642_v47 = vadd.f32 6.0, %v1845_v14  ;;  %v643_v49 = vadd.f32 6.0, %v1848_v15  ;;  %p1448_p5 = pnand %p1447_p3, %p1757_p10  ;;  %s1452_s24 = scalar_lea.vmem %s1451_s19, 512 }
  0xa4   : > { %1100 = vmatpush3.bf16.msra.mxu0 %v1273_v2  ;;  %1120 = vmatpush3.bf16.msra.mxu1 %v1281_v6  ;;  %v1289_v21 = vld [vmem:[#allocation8 + $0x8] sm:$0xff]   ;;  %v1290_v22 = vld [vmem:[#allocation8 + $0x10] sm:$0xff]   ;;  %v1291_v23 = vld [vmem:[#allocation8 + $0x18] sm:$0xff]   ;;  %p1453_p12 = scmp.lt.s32.totalorder %s1894_s9, %s1451_s19  ;;  %p1454_p1 = scmp.lt.s32.totalorder %s1452_s24, %s1446_s13 }
  0xa5   : > { %1101 = vmatprep.subr.bf16.mxu0 %v1531_v0  ;;  %1121 = vmatprep.subr.bf16.mxu1 %v1531_v0  ;;  %v1292_v24 = vld [vmem:[#allocation8 + $0x20] sm:$0xff]   ;;  %v1293_v25 = vld [vmem:[#allocation8 + $0x28] sm:$0xff]   ;;  %v1294_v36 = vld [vmem:[#allocation8 + $0x30] sm:$0xff]   ;;  %s1899_s17 = scalar_lea.hbm %s1976_s15, %s1060_s30  ;;  %p1449_p7 = pneg %p1448_p5 }
  0xa6   : > { %v1018_v26 = vld [vmem:[%s1945_s2] ss:$0 sm:$0xff]  ;;  %v1295_v37 = vld [vmem:[#allocation8 + $0x38] sm:$0xff]   ;;  %v1297_v39 = vld [vmem:[#allocation10 + $0x8] sm:$0xff]   ;;  %p1455_p2 = por %p1454_p1, %p1453_p12 }
  0xa7   : > { %v1296_v38 = vld [vmem:[#allocation10] sm:$0xff]   ;;  %v1298_v40 = vld [vmem:[#allocation10 + $0x10] sm:$0xff]   ;;  %v1299_v41 = vld [vmem:[#allocation10 + $0x18] sm:$0xff]  }
  0xa8   : > { %1102 = vmatpush3.bf16.msra.mxu0 %v1274_v3  ;;  %1122 = vmatpush3.bf16.msra.mxu1 %v1282_v8  ;;  %v1300_v42 = vld [vmem:[#allocation10 + $0x20] sm:$0xff]   ;;  %v1301_v43 = vld [vmem:[#allocation10 + $0x28] sm:$0xff]   ;;  %v1302_v56 = vld [vmem:[#allocation10 + $0x30] sm:$0xff]   ;;  %p1456_p13 = pnand %p1455_p2, %p1449_p7 }
  0xa9   : > { %1103 = vmatprep.subr.bf16.mxu0 %v1531_v0  ;;  %1123 = vmatprep.subr.bf16.mxu1 %v1531_v0  ;;  %v1027_v44 = vld [vmem:[%s1946_s3] ss:$0 sm:$0xff]  ;;  %v1303_v57 = vld [vmem:[#allocation10 + $0x38] sm:$0xff]  }
  0xaa   : > { %v1036_v58 = vld [vmem:[%s1949_s6] ss:$0 sm:$0xff] }
  0xac   : > { %1104 = vmatpush3.bf16.msra.mxu0 %v1275_v5  ;;  %1124 = vmatpush3.bf16.msra.mxu1 %v1283_v10 }
  0xad   : > { %1105 = vmatprep.subr.bf16.mxu0 %v1531_v0  ;;  %1125 = vmatprep.subr.bf16.mxu1 %v1531_v0 }
  0xb0   : > { %1106 = vmatpush3.bf16.msra.mxu0 %v1276_v7  ;;  %1126 = vmatpush3.bf16.msra.mxu1 %v1284_v12 }
  0xb1   : > { %1107 = vmatprep.subr.bf16.mxu0 %v1531_v0  ;;  %1127 = vmatprep.subr.bf16.mxu1 %v1531_v0 }
  0xb4   : > { %1108 = vmatpush3.bf16.msra.mxu0 %v1277_v9  ;;  %1128 = vmatpush3.bf16.msra.mxu1 %v1285_v16 }
  0xb5   : > { %1109 = vmatprep.subr.bf16.mxu0 %v1531_v0  ;;  %1129 = vmatprep.subr.bf16.mxu1 %v1531_v0 }
  0xb8   : > { %1110 = vmatpush3.bf16.msra.mxu0 %v1278_v11  ;;  %1130 = vmatpush3.bf16.msra.mxu1 %v1286_v18 }
  0xb9   : > { %1111 = vmatprep.subr.bf16.mxu0 %v1531_v0  ;;  %1131 = vmatprep.subr.bf16.mxu1 %v1531_v0 }
  0xbc   : > { %1112 = vmatpush3.bf16.msra.mxu0 %v1279_v13  ;;  %1132 = vmatpush3.bf16.msra.mxu1 %v1287_v19 }
  0xbd   : > { %1137 = vmatprep.subr.bf16.mxu0 %v1531_v0  ;;  %1157 = vmatprep.subr.bf16.mxu1 %v1531_v0 }
  0xbf   : > { %1114 = vmatmul.mubr.bf16.vlgmr.msra.gmra.mrb[0].mxu0 %v414_v17 }
  0xc0   : > { %1153 = vmatprep.mubr.msk.bf16.mxu0 %vm1532_vm0, %v1531_v0  ;;  %1138 = vmatpush3.bf16.msra.mxu0 %v1288_v20 }
  0xc1   : > { %1139 = vmatprep.subr.bf16.mxu0 %v1531_v0 }
  0xc4   : > { %1140 = vmatpush3.bf16.msra.mxu0 %v1289_v21 }
  0xc5   : > { %1141 = vmatprep.subr.bf16.mxu0 %v1531_v0 }
  0xc8   : > { %1142 = vmatpush3.bf16.msra.mxu0 %v1290_v22 }
  0xc9   : > { %1143 = vmatprep.subr.bf16.mxu0 %v1531_v0 }
  0xcc   : > { %1144 = vmatpush3.bf16.msra.mxu0 %v1291_v23 }
  0xcd   : > { %1145 = vmatprep.subr.bf16.mxu0 %v1531_v0 }
  0xd0   : > { %1146 = vmatpush3.bf16.msra.mxu0 %v1292_v24 }
  0xd1   : > { %1147 = vmatprep.subr.bf16.mxu0 %v1531_v0 }
  0xd4   : > { %1148 = vmatpush3.bf16.msra.mxu0 %v1293_v25 }
  0xd5   : > { %1149 = vmatprep.subr.bf16.mxu0 %v1531_v0 }
  0xd8   : > { %1150 = vmatpush3.bf16.msra.mxu0 %v1294_v36 }
  0xd9   : > { %1151 = vmatprep.subr.bf16.mxu0 %v1531_v0 }
  0xdc   : > { %1152 = vmatpush3.bf16.msra.mxu0 %v1295_v37 }
 0x192   : > { %v520_v27 = vpop.f32.mrb[0].mxu0 }
 0x193   : > { %v521_v28 = vadd.f32 %v1018_v26, %v520_v27  ;;  %v1115_v29 = vpop.f32.mrb[1].mxu0 }
 0x194   : > { %v523_v30 = vpop.f32.mrb[2].mxu0 }
 0x195   : > { %v524_v31 = vadd.f32 %v1018_v26, %v523_v30  ;;  %v1116_v32 = vpop.f32.mrb[3].mxu0  ;;  %v527_v33 = vmax.f32 %v521_v28, 0.0 }
 0x197   : > { %v528_v34 = vmax.f32 %v524_v31, 0.0 }
 0x199   : > { %v529_v35 = vpack.c.bf16 %v528_v34, %v527_v33 }
 0x19b   : > { %1134 = vmatmul.mubr.bf16.vlgmr.msra.gmra.mrb[0].mxu1 %v529_v35 }
 0x19c   : > { %1173 = vmatprep.mubr.msk.bf16.mxu1 %vm1532_vm0, %v1531_v0  ;;  %1158 = vmatpush3.bf16.msra.mxu1 %v1296_v38 }
 0x19d   : > { %1159 = vmatprep.subr.bf16.mxu1 %v1531_v0 }
 0x1a0   : > { %1160 = vmatpush3.bf16.msra.mxu1 %v1297_v39 }
 0x1a1   : > { %1161 = vmatprep.subr.bf16.mxu1 %v1531_v0 }
 0x1a4   : > { %1162 = vmatpush3.bf16.msra.mxu1 %v1298_v40 }
 0x1a5   : > { %1163 = vmatprep.subr.bf16.mxu1 %v1531_v0 }
 0x1a8   : > { %1164 = vmatpush3.bf16.msra.mxu1 %v1299_v41 }
 0x1a9   : > { %1165 = vmatprep.subr.bf16.mxu1 %v1531_v0 }
 0x1ac   : > { %1166 = vmatpush3.bf16.msra.mxu1 %v1300_v42 }
 0x1ad   : > { %1167 = vmatprep.subr.bf16.mxu1 %v1531_v0 }
 0x1b0   : > { %1168 = vmatpush3.bf16.msra.mxu1 %v1301_v43 }
 0x1b1   : > { %1169 = vmatprep.subr.bf16.mxu1 %v1531_v0 }
 0x1b4   : > { %1170 = vmatpush3.bf16.msra.mxu1 %v1302_v56 }
 0x1b5   : > { %1171 = vmatprep.subr.bf16.mxu1 %v1531_v0  ;;  %v1045_v0 = vld [vmem:[%s1951_s8] ss:$0 sm:$0xff] }
 0x1b8   : > { %1172 = vmatpush3.bf16.msra.mxu1 %v1303_v57 }
 0x26e   : > { %v635_v45 = vpop.f32.mrb[0].mxu1 }
 0x26f   : > { %v636_v46 = vadd.f32 %v1027_v44, %v635_v45  ;;  %v1135_v48 = vpop.f32.mrb[1].mxu1 }
 0x270   : > { %v638_v50 = vpop.f32.mrb[2].mxu1 }
 0x271   : > { %v639_v51 = vadd.f32 %v1027_v44, %v638_v50  ;;  %v1136_v52 = vpop.f32.mrb[3].mxu1  ;;  %v644_v53 = vmin.f32 %v636_v46, %v642_v47 }
 0x273   : > { %v645_v54 = vmin.f32 %v639_v51, %v643_v49 }
 0x275   : > { %v646_v55 = vpack.c.bf16 %v645_v54, %v644_v53 }
 0x277   : > { %1154 = vmatmul.mubr.bf16.vlgmr.msra.gmra.mrb[4].mxu0 %v646_v55 }
 0x34a   : > { %v752_v59 = vpop.f32.mrb[4].mxu0 }
 0x34b   : > { %v753_v60 = vadd.f32 %v1036_v58, %v752_v59  ;;  %v1155_v61 = vpop.f32.mrb[5].mxu0 }
 0x34c   : > { %v755_v62 = vpop.f32.mrb[6].mxu0 }
 0x34d   : > { %v756_v63 = vadd.f32 %v1036_v58, %v755_v62  ;;  %v1156_v1 = vpop.f32.mrb[7].mxu0  ;;  %v759_v2 = vmax.f32 %v753_v60, 0.0 }
 0x34f   : > { %v760_v3 = vmax.f32 %v756_v63, 0.0 }
 0x351   : > { %v761_v4 = vpack.c.bf16 %v760_v3, %v759_v2 }
 0x353   : > { %1174 = vmatmul.mubr.bf16.vlgmr.msra.gmra.mrb[4].mxu1 %v761_v4 }
 0x426   : > { %v867_v5 = vpop.f32.mrb[4].mxu1 }
 0x427   : > { %v868_v6 = vadd.f32 %v1045_v0, %v867_v5  ;;  %v1175_v7 = vpop.f32.mrb[5].mxu1 }
 0x428   : > { %v870_v8 = vpop.f32.mrb[6].mxu1 }
 0x429   : > { %874 = vst [vmem:[%s408_s20] sm:$0xff] %v868_v6  ;;  %v871_v9 = vadd.f32 %v1045_v0, %v870_v8  ;;  %v1176_v10 = vpop.f32.mrb[7].mxu1 }
 0x42b   : > { %875 = vst [vmem:[%s408_s20 + $0x8] sm:$0xff] %v871_v9 }
 0x42c   : > { %1459 = shalt.err (!%p1456_p13)
}
 0x42d   : > { %s1460_s22 = scalar_lea.hbm %s1899_s17, 256  ;;  %s1464_s20 = scalar_lea.hbm %s1976_s15, 512 }
 0x42e   : > { %p1461_p9 = scmp.ne.s32.totalorder %s1899_s17, %s1460_s22  ;;  %p1465_p4 = scmp.lt.u32.totalorder %s1899_s17, %s1976_s15 }
 0x42f   : > { %p1466_p8 = scmp.lt.u32.totalorder %s1464_s20, %s1460_s22  ;;  %p1468_p3 = scmp.lt.u32.totalorder %s1460_s22, %s1899_s17 }
 0x430   : > { %p1462_p0 = pnand %p1461_p9, %p1757_p10 }
 0x431   : > { %p1467_p6 = por %p1466_p8, %p1465_p4 }
 0x432   : > { %p1463_p11 = pneg %p1462_p0 }
 0x433   : > { %p1469_p5 = por %p1468_p3, %p1467_p6 }
 0x435   : > { %p1470_p7 = pnand %p1469_p5, %p1463_p11 }
 0x437   : > { %1473 = shalt.err (!%p1470_p7)
}
 0x438   : > { %s1534_s29 = smov 128   ;;  %s1535_s13 = smov 8  }
 0x439   : > { %1195 = dma.vmem_to_hbm [thread:$0]  (%p1757_p10), %s1894_s9, 256, %s1899_s17, %s877_s25, %s1534_s29, %s1534_s29, %s1535_s13  }
 0x43a PF: > { %s1977_s21 = sld [smem:[#allocation16_spill]]  ;;  %s1978_s19 = sld [smem:[#allocation17_spill]] }
 0x43b   : > { %p1980_p1 = scmp.ge.s32.totalorder %s1520_s12, 2 }
 0x440   : > { %s905_s24 = sand.u32 1, %s1977_s21   ;;  %p1979_p12 = scmp.ne.s32.totalorder %s1978_s19, 0 }
 0x441   : > { %s906_s22 = scalar_lea.sflag [#allocation4], %s905_s24 }
 0x442   : > { %p1215_p2 = pnand %p1980_p1, %p1979_p12 }
 0x444   : > { %1503 = dma.done.wait (!%p1215_p2), %s906_s22, 256  }
 0x445   : > { %1505 = vsyncadd (!%p1215_p2), %s906_s22, 4294967040  ;;  %p24_p13 = scmp.ge.s32.totalorder %s1747_s14, 4   ;;  %s1981_s30 = smov %s1512_s10 }
 0x446   : > { %s1982_s10 = smov %s1516_s11  ;;  %s1983_s11 = smov %s1763_s28 }
 0x447   : > { %s1984_s12 = smov %s1747_s14  ;;  %26 = sbr.rel (!%p24_p13) target bundleno = 9 (0x9), region = 117 }
 0x44e   :  { %911 = vsyncpa [#allocation3], 1 }
 0x44f   :  { %913 = vsyncpa [#allocation3 + $0x1], 1 }
 0x450   :  { %914 = vsyncpa [#allocation6], 1 }
 0x451   :  { %915 = vsyncpa [#allocation9], 1 }
 0x452   :  { %916 = vsyncpa [#allocation4], 1 }
 0x453   :  { %918 = vsyncpa [#allocation4 + $0x1], 1 }

// kernel: tpu_custom_call.1
= control target key start
LH: loop header
LB: loop body
LE: loop exit
PB: predicated region body
PF: predicated region fallthrough
CT: control target
= control target key end

     0   :  { %s1943_s0 = inlined_call_operand.hbm [shape: f32[32,128], index: 0, kind: input, shape index: {}]   ;;  %s1944_s1 = inlined_call_operand.hbm [shape: bf16[128,128], index: 1, kind: input, shape index: {}]   ;;  %s1945_s2 = inlined_call_operand.vmem [shape: f32[1,128], index: 2, kind: input, shape index: {}]   ;;  %s1946_s3 = inlined_call_operand.vmem [shape: f32[1,128], index: 3, kind: input, shape index: {}]   ;;  %s1947_s4 = inlined_call_operand.hbm [shape: bf16[128,128], index: 4, kind: input, shape index: {}]   ;;  %s1948_s5 = inlined_call_operand.hbm [shape: bf16[128,128], index: 5, kind: input, shape index: {}]   ;;  %s1949_s6 = inlined_call_operand.vmem [shape: f32[1,128], index: 6, kind: input, shape index: {}]   ;;  %s1950_s7 = inlined_call_operand.hbm [shape: bf16[128,128], index: 7, kind: input, shape index: {}]   ;;  %s1951_s8 = inlined_call_operand.vmem [shape: f32[1,128], index: 8, kind: input, shape index: {}]   ;;  %s1952_s9 = inlined_call_operand.hbm [shape: f32[32,128], index: 9, kind: output, shape index: {}]  }
   0x1   :  { %1959 = sst [smem:[#allocation18_spill]] %s1952_s9 }
   0x2   :  { %14 = vsyncpa [#allocation3], 0 }
   0x3   :  { %16 = vsyncpa [#allocation3 + $0x1], 0 }
   0x4   :  { %17 = vsyncpa [#allocation6], 0 }
   0x5   :  { %18 = vsyncpa [#allocation9], 0 }
   0x6   :  { %19 = vsyncpa [#allocation4], 0 }
   0x7   :  { %21 = vsyncpa [#allocation4 + $0x1], 0  ;;  %s1586_s30 = smov 0   ;;  %s1588_s10 = smov 0  }
   0x8   :  { %s1590_s11 = smov 0   ;;  %s1592_s12 = smov 0  }
   0x9 LB: > { %1960 = sst [smem:[#allocation16_spill]] %s1508_s30  ;;  %s1607_s13 = sadd.s32 4294967295, %s1520_s12   ;;  %s1520_s12 = sphi %s1592_s12, %s1984_s12   ;;  %s1516_s11 = sphi %s1590_s11, %s1983_s11   ;;  %s1512_s10 = sphi %s1588_s10, %s1982_s10   ;;  %s1508_s30 = sphi %s1586_s30, %s1981_s30  }
   0xa   : > { %s1001_s14 = sadd.s32 4294967294, %s1520_s12   ;;  %p47_p0 = scmp.ne.s32.totalorder %s1512_s10, %s1508_s30 }
   0xb   : > { %p1953_p1 = scmp.eq.s32.totalorder %s1607_s13, 0  ;;  %p245_p3 = scmp.eq.s32.totalorder %s1001_s14, 1 }
   0xc   : > { %p1002_p5 = scmp.ge.s32.totalorder %s1520_s12, 1  ;;  %p252_p7 = scmp.lt.s32.totalorder %s1520_s12, 3 }
   0xd   : > { %p1616_p4 = por %p1953_p1, %p47_p0  ;;  %p1621_p6 = por %p245_p3, %p47_p0 }
   0xe   : > { %p1626_p8 = pnand %p1002_p5, %p252_p7  ;;  %s1522_s18 = smov [#allocation5]  }
   0xf   : > { %s1961_s15 = scalar_select %p1616_p4, 1, 0 }
  0x10   : > { %s1962_s16 = scalar_select %p1621_p6, 1, 0 }
  0x11   : > { %s1964_s17 = scalar_select %p1626_p8, 1, 0 }
  0x12   : > { %1963 = sst [smem:[#allocation17_spill]] %s1962_s16  ;;  %s264_s19 = sshll.u32 %s1522_s18, 4  ;;  %s1630_s19 = int_to_ptr.vmem [resolvable:$true] %s264_s19 }
  0x13   : > { %p1197_p9 = pneg %p1626_p8  ;;  %s1523_s21 = smov [#allocation8]  }
  0x14   : > { %s296_s22 = sshll.u32 %s1523_s21, 4  ;;  %s1524_s23 = smov [#allocation7]   ;;  %s1641_s22 = int_to_ptr.vmem [resolvable:$true] %s296_s22 }
  0x15   : > { %p1637_p11 = pnand %p1197_p9, %p1953_p1  ;;  %s1643_s24 = sshll.u32 %s1524_s23, 4  ;;  %s284_s24 = int_to_ptr.vmem [resolvable:$true] %s1643_s24 }
  0x16   : > { %s1304_s27 = scalar_lea.hbm %s1944_s1, 1024 }
  0x17   : > { %p1305_p12 = scmp.ne.s32.totalorder %s1944_s1, %s1304_s27  ;;  %p1653_p13 = pneg %p1637_p11 }
  0x18   : > { %p1311_p5 = scmp.lt.u32.totalorder %s1304_s27, %s1944_s1 }
  0x19   : > { %p1307_p0 = pnand %p1653_p13, %p1305_p12 }
  0x1b   : > { %p1308_p3 = pneg %p1307_p0 }
  0x1d   : > { %p1313_p7 = pnand %p1311_p5, %p1308_p3 }
  0x1f   : > { %1316 = shalt.err (!%p1313_p7)
}
  0x20   : > { %s1317_s23 = scalar_lea.vmem %s1630_s19, 1024  ;;  %p1325_p2 = scmp.lt.s32.totalorder %s1630_s19, %s1630_s19 }
  0x21   : > { %p1318_p9 = scmp.ne.s32.totalorder %s1630_s19, %s1317_s23  ;;  %p1326_p6 = scmp.lt.s32.totalorder %s1317_s23, %s1317_s23 }
  0x23   : > { %p1320_p10 = pnand %p1318_p9, %p1653_p13  ;;  %p1327_p12 = por %p1326_p6, %p1325_p2 }
  0x25   : > { %p1321_p1 = pneg %p1320_p10 }
  0x27   : > { %p1328_p0 = pnand %p1327_p12, %p1321_p1 }
  0x29   : > { %1331 = shalt.err (!%p1328_p0)
}
  0x2a   : > { %s1525_s25 = smov 64   ;;  %s1526_s26 = smov 4  }
  0x2b   : > { %1200 = dma.hbm_to_vmem [thread:$0]  (!%p1637_p11), %s1944_s1, 1024, %s1630_s19, [#allocation6], %s1525_s25, %s1525_s25, %s1526_s26  }
  0x2c   : > { %s1332_s21 = scalar_lea.hbm %s1948_s5, 1024 }
  0x2d   : > { %p1333_p1 = scmp.ne.s32.totalorder %s1948_s5, %s1332_s21  ;;  %p1339_p10 = scmp.lt.u32.totalorder %s1332_s21, %s1948_s5 }
  0x2f   : > { %p1335_p2 = pnand %p1333_p1, %p1653_p13 }
  0x31   : > { %p1336_p6 = pneg %p1335_p2 }
  0x33   : > { %p1341_p3 = pnand %p1339_p10, %p1336_p6 }
  0x35   : > { %1344 = shalt.err (!%p1341_p3)
}
  0x36   : > { %s1345_s19 = scalar_lea.vmem %s1641_s22, 1024  ;;  %p1353_p12 = scmp.lt.s32.totalorder %s1641_s22, %s1641_s22 }
  0x37   : > { %p1346_p5 = scmp.ne.s32.totalorder %s1641_s22, %s1345_s19  ;;  %p1354_p0 = scmp.lt.s32.totalorder %s1345_s19, %s1345_s19 }
  0x39   : > { %p1348_p7 = pnand %p1346_p5, %p1653_p13  ;;  %p1355_p1 = por %p1354_p0, %p1353_p12 }
  0x3b   : > { %p1349_p9 = pneg %p1348_p7 }
  0x3d   : > { %p1356_p2 = pnand %p1355_p1, %p1349_p9 }
  0x3f   : > { %1359 = shalt.err (!%p1356_p2)
}
  0x40   : > { %1206 = dma.hbm_to_vmem [thread:$0]  (!%p1637_p11), %s1948_s5, 1024, %s1641_s22, [#allocation9], %s1525_s25, %s1525_s25, %s1526_s26  }
  0x41   : > { %s1360_s28 = scalar_lea.hbm %s1947_s4, 1024 }
  0x42   : > { %p1361_p6 = scmp.ne.s32.totalorder %s1947_s4, %s1360_s28  ;;  %p1367_p5 = scmp.lt.u32.totalorder %s1360_s28, %s1947_s4 }
  0x44   : > { %p1363_p10 = pnand %p1361_p6, %p1653_p13 }
  0x46   : > { %p1364_p3 = pneg %p1363_p10 }
  0x48   : > { %p1369_p7 = pnand %p1367_p5, %p1364_p3 }
  0x4a   : > { %1372 = shalt.err (!%p1369_p7)
}
  0x4b   : > { %s1373_s19 = scalar_lea.vmem %s284_s24, 1024  ;;  %p1381_p1 = scmp.lt.s32.totalorder %s284_s24, %s284_s24 }
  0x4c   : > { %p1374_p9 = scmp.ne.s32.totalorder %s284_s24, %s1373_s19  ;;  %p1382_p2 = scmp.lt.s32.totalorder %s1373_s19, %s1373_s19 }
  0x4e   : > { %p1376_p12 = pnand %p1374_p9, %p1653_p13  ;;  %p1383_p4 = por %p1382_p2, %p1381_p1 }
  0x50   : > { %p1377_p0 = pneg %p1376_p12 }
  0x52   : > { %p1384_p8 = pnand %p1383_p4, %p1377_p0 }
  0x54   : > { %1387 = shalt.err (!%p1384_p8)
}
  0x55   : > { %1203 = dma.hbm_to_vmem [thread:$0]  (!%p1637_p11), %s1947_s4, 1024, %s284_s24, [#allocation6], %s1525_s25, %s1525_s25, %s1526_s26  }
  0x56   : > { %s1527_s30 = smov [#allocation10]   ;;  %s1388_s29 = scalar_lea.hbm %s1950_s7, 1024 }
  0x57   : > { %s312_s16 = sshll.u32 %s1527_s30, 4  ;;  %p1389_p4 = scmp.ne.s32.totalorder %s1950_s7, %s1388_s29  ;;  %s313_s16 = int_to_ptr.vmem [resolvable:$true] %s312_s16 }
  0x58   : > { %p1395_p10 = scmp.lt.u32.totalorder %s1388_s29, %s1950_s7 }
  0x59   : > { %p1391_p8 = pnand %p1389_p4, %p1653_p13 }
  0x5b   : > { %p1392_p6 = pneg %p1391_p8 }
  0x5d   : > { %p1397_p3 = pnand %p1395_p10, %p1392_p6 }
  0x5f   : > { %1400 = shalt.err (!%p1397_p3)
}
  0x60   : > { %s1401_s24 = scalar_lea.vmem %s313_s16, 1024  ;;  %p1409_p12 = scmp.lt.s32.totalorder %s313_s16, %s313_s16 }
  0x61   : > { %p1402_p5 = scmp.ne.s32.totalorder %s313_s16, %s1401_s24  ;;  %p1410_p0 = scmp.lt.s32.totalorder %s1401_s24, %s1401_s24 }
  0x63   : > { %p1404_p7 = pnand %p1402_p5, %p1653_p13  ;;  %p1411_p1 = por %p1410_p0, %p1409_p12 }
  0x65   : > { %p1405_p9 = pneg %p1404_p7 }
  0x67   : > { %p1412_p2 = pnand %p1411_p1, %p1405_p9 }
  0x69   : > { %1415 = shalt.err (!%p1412_p2)
}
  0x6a   : > { %1209 = dma.hbm_to_vmem [thread:$0]  (!%p1637_p11), %s1950_s7, 1024, %s313_s16, [#allocation9], %s1525_s25, %s1525_s25, %s1526_s26  }
  0x6b   : > { %s1747_s14 = sadd.s32 1, %s1520_s12   ;;  %s34_s20 = sadd.s32 1, %s1516_s11 }
  0x6c   : > { %s31_s30 = ssub.s32 %s1520_s12, %s1747_s14  ;;  %p41_p13 = scmp.ne.s32.totalorder %s1516_s11, %s1512_s10 }
  0x6d   : > { %p32_p4 = scmp.eq.s32.totalorder %s31_s30, 0  ;;  %p42_p8 = scmp.eq.s32.totalorder %s1520_s12, 0 }
  0x6e   : > { %p1967_p6 = scmp.eq.s32.totalorder %s1607_s13, 1  ;;  %p1222_p3 = scmp.lt.s32.totalorder %s1520_s12, 2 }
  0x6f   : > { %s1763_s28 = scalar_select %p32_p4, %s1516_s11, %s34_s20  }
  0x70   : > { %p1757_p10 = por %p1967_p6, %p41_p13  ;;  %p43_p5 = por %p42_p8, %p41_p13 }
  0x71   : > { %s329_s29 = sand.u32 1, %s1516_s11   ;;  %s1059_s25 = sshll.u32 %s1520_s12, 8 }
  0x72   : > { %s1008_s18 = sshll.u32 %s329_s29, 4  ;;  %s1770_s21 = scalar_lea.hbm %s1943_s0, %s1059_s25 }
  0x73   : > { %s333_s23 = scalar_lea.vmem [#allocation2], %s1008_s18  ;;  %p1774_p11 = pnand %p1222_p3, %p43_p5 }
  0x74   : > { %s340_s19 = sshll.u32 %s333_s23, 4  ;;  %s1778_s22 = scalar_lea.sflag [#allocation3], %s329_s29  ;;  %s1772_s19 = int_to_ptr.vmem [resolvable:$true] %s340_s19 }
  0x75   : > { %s1416_s9 = scalar_lea.hbm %s1770_s21, 256  ;;  %p1418_p9 = pneg %p1774_p11 }
  0x76   : > { %p1417_p7 = scmp.ne.s32.totalorder %s1770_s21, %s1416_s9  ;;  %s1421_s18 = scalar_lea.hbm %s1943_s0, 512 }
  0x77   : > { %p1422_p1 = scmp.lt.u32.totalorder %s1770_s21, %s1943_s0  ;;  %p1423_p2 = scmp.lt.u32.totalorder %s1421_s18, %s1416_s9 }
  0x78   : > { %p1419_p12 = pnand %p1418_p9, %p1417_p7  ;;  %p1425_p4 = scmp.lt.u32.totalorder %s1416_s9, %s1770_s21 }
  0x79   : > { %p1424_p13 = por %p1423_p2, %p1422_p1 }
  0x7a   : > { %p1420_p0 = pneg %p1419_p12 }
  0x7b   : > { %p1426_p8 = por %p1425_p4, %p1424_p13 }
  0x7d   : > { %p1427_p6 = pnand %p1426_p8, %p1420_p0 }
  0x7f   : > { %1430 = shalt.err (!%p1427_p6)
}
  0x80   : > { %s1431_s29 = scalar_lea.vmem %s1772_s19, 256  ;;  %s1528_s16 = smov [#allocation2]  }
  0x81   : > { %p1432_p3 = scmp.ne.s32.totalorder %s1772_s19, %s1431_s29  ;;  %s1436_s23 = sshll.u32 %s1528_s16, 4  ;;  %s1437_s23 = int_to_ptr.vmem [resolvable:$false] %s1436_s23 }
  0x82   : > { %s1438_s20 = scalar_lea.vmem %s1437_s23, 512  ;;  %p1439_p12 = scmp.lt.s32.totalorder %s1772_s19, %s1437_s23 }
  0x83   : > { %p1434_p5 = pnand %p1432_p3, %p1418_p9  ;;  %p1440_p1 = scmp.lt.s32.totalorder %s1438_s20, %s1431_s29 }
  0x85   : > { %p1435_p7 = pneg %p1434_p5  ;;  %p1441_p2 = por %p1440_p1, %p1439_p12 }
  0x87   : > { %p1442_p13 = pnand %p1441_p2, %p1435_p7 }
  0x89   : > { %1445 = shalt.err (!%p1442_p13)
}
  0x8a   : > { %s1529_s9 = smov 128   ;;  %s1530_s30 = smov 8  }
  0x8b   : > { %1213 = dma.hbm_to_vmem [thread:$0]  (!%p1774_p11), %s1770_s21, 256, %s1772_s19, %s1778_s22, %s1529_s9, %s1529_s9, %s1530_s30  }
  0x8c   : > { %p1970_p9 = scmp.ne.s32.totalorder %s1964_s17, 0 }
  0x8d   : > { %s1809_s18 = sand.u32 (!%p1970_p9), 1, %s1512_s10   ;;  %p1971_p0 = scmp.ne.s32.totalorder (!%p1970_p9), %s1961_s15, 0 }
  0x8e   : > { %352 = sbr.rel (%p1970_p9) target bundleno = 1082 (0x43a), region = 56  ;;  %s1012_s25 = sshll.u32 (!%p1970_p9), %s1809_s18, 4 }
  0x8f   : > { %s355_s26 = scalar_lea.sflag (!%p1970_p9), [#allocation3], %s1809_s18  ;;  %s1815_s29 = scalar_lea.vmem (!%p1970_p9), [#allocation2], %s1012_s25 }
  0x95   : > { %1491 = dma.done.wait (%p1971_p0), %s355_s26, 256  }
  0x96   : > { %1493 = vsyncadd (%p1971_p0), %s355_s26, 4294967040  ;;  %p1972_p11 = scmp.eq.s32.totalorder %s1607_s13, 0 }
  0x98   : > { %1495 = dma.done.wait (%p1972_p11), [#allocation6], 2048   ;;  %p1973_p4 = pmov %p1972_p11 }
  0x9a   : > { %1497 = vsyncadd (%p1973_p4), [#allocation6], 4294965248  ;;  %p1974_p8 = pmov %p1973_p4 }
  0x9b   : > { %p1975_p6 = pmov %p1973_p4 }
  0x9c   : > { %1499 = dma.done.wait (%p1974_p8), [#allocation9], 2048  }
  0x9d   : > { %1501 = vsyncadd (%p1975_p6), [#allocation9], 4294965248  ;;  %v1531_v0 = vmov 0.0   ;;  %vm1532_vm0 = vmmov 0   ;;  %v1272_v1 = vld [vmem:[#allocation5] sm:$0xff]   ;;  %v1273_v2 = vld [vmem:[#allocation5 + $0x8] sm:$0xff]  }
  0x9e   : > { %1097 = vmatprep.subr.bf16.mxu0 %v1531_v0  ;;  %1113 = vmatprep.mubr.msk.bf16.mxu0 %vm1532_vm0, %v1531_v0  ;;  %v1274_v3 = vld [vmem:[#allocation5 + $0x10] sm:$0xff]   ;;  %v1280_v4 = vld [vmem:[#allocation7] sm:$0xff]   ;;  %v1275_v5 = vld [vmem:[#allocation5 + $0x18] sm:$0xff]   ;;  %s408_s20 = scalar_lea.vmem [#allocation11], %s1012_s25  ;;  %s1060_s30 = sshll.u32 %s1607_s13, 8 }
  0x9f   : > { %1117 = vmatprep.subr.bf16.mxu1 %v1531_v0  ;;  %1133 = vmatprep.mubr.msk.bf16.mxu1 %vm1532_vm0, %v1531_v0  ;;  %v1281_v6 = vld [vmem:[#allocation7 + $0x8] sm:$0xff]   ;;  %v1276_v7 = vld [vmem:[#allocation5 + $0x20] sm:$0xff]   ;;  %v1282_v8 = vld [vmem:[#allocation7 + $0x10] sm:$0xff]   ;;  %s890_s9 = sshll.u32 %s408_s20, 4  ;;  %s1976_s15 = sld [smem:[#allocation18_spill]]  ;;  %s1894_s9 = int_to_ptr.vmem [resolvable:$true] %s890_s9 }
  0xa0   : > { %1098 = vmatpush3.bf16.msra.mxu0 %v1272_v1  ;;  %1118 = vmatpush3.bf16.msra.mxu1 %v1280_v4  ;;  %v1277_v9 = vld [vmem:[#allocation5 + $0x28] sm:$0xff]   ;;  %v1283_v10 = vld [vmem:[#allocation7 + $0x18] sm:$0xff]   ;;  %v1278_v11 = vld [vmem:[#allocation5 + $0x30] sm:$0xff]   ;;  %s877_s25 = scalar_lea.sflag [#allocation4], %s1809_s18  ;;  %s1446_s13 = scalar_lea.vmem %s1894_s9, 256 }
  0xa1   : > { %1099 = vmatprep.subr.bf16.mxu0 %v1531_v0  ;;  %1119 = vmatprep.subr.bf16.mxu1 %v1531_v0  ;;  %v1284_v12 = vld [vmem:[#allocation7 + $0x20] sm:$0xff]   ;;  %v1279_v13 = vld [vmem:[#allocation5 + $0x38] sm:$0xff]   ;;  %v1285_v16 = vld [vmem:[#allocation7 + $0x28] sm:$0xff]   ;;  %p1447_p3 = scmp.ne.s32.totalorder %s1894_s9, %s1446_s13  ;;  %s1533_s21 = smov [#allocation11]  }
  0xa2   : > { %v1845_v14 = vld [vmem:[%s1815_s29] sm:$0xff]  ;;  %v1848_v15 = vld [vmem:[%s1815_s29 + $0x8] sm:$0xff]  ;;  %s1450_s19 = sshll.u32 %s1533_s21, 4  ;;  %s1451_s19 = int_to_ptr.vmem [resolvable:$false] %s1450_s19 }
  0xa3   : > { %v414_v17 = vpack.c.bf16 %v1848_v15, %v1845_v14  ;;  %v1286_v18 = vld [vmem:[#allocation7 + $0x30] sm:$0xff]   ;;  %v1287_v19 = vld [vmem:[#allocation7 + $0x38] sm:$0xff]   ;;  %v1288_v20 = vld [vmem:[#allocation8] sm:$0xff]   ;;  %v642_v47 = vadd.f32 6.0, %v1845_v14  ;;  %v643_v49 = vadd.f32 6.0, %v1848_v15  ;;  %p1448_p5 = pnand %p1447_p3, %p1757_p10  ;;  %s1452_s24 = scalar_lea.vmem %s1451_s19, 512 }
  0xa4   : > { %1100 = vmatpush3.bf16.msra.mxu0 %v1273_v2  ;;  %1120 = vmatpush3.bf16.msra.mxu1 %v1281_v6  ;;  %v1289_v21 = vld [vmem:[#allocation8 + $0x8] sm:$0xff]   ;;  %v1290_v22 = vld [vmem:[#allocation8 + $0x10] sm:$0xff]   ;;  %v1291_v23 = vld [vmem:[#allocation8 + $0x18] sm:$0xff]   ;;  %p1453_p12 = scmp.lt.s32.totalorder %s1894_s9, %s1451_s19  ;;  %p1454_p1 = scmp.lt.s32.totalorder %s1452_s24, %s1446_s13 }
  0xa5   : > { %1101 = vmatprep.subr.bf16.mxu0 %v1531_v0  ;;  %1121 = vmatprep.subr.bf16.mxu1 %v1531_v0  ;;  %v1292_v24 = vld [vmem:[#allocation8 + $0x20] sm:$0xff]   ;;  %v1293_v25 = vld [vmem:[#allocation8 + $0x28] sm:$0xff]   ;;  %v1294_v36 = vld [vmem:[#allocation8 + $0x30] sm:$0xff]   ;;  %s1899_s17 = scalar_lea.hbm %s1976_s15, %s1060_s30  ;;  %p1449_p7 = pneg %p1448_p5 }
  0xa6   : > { %v1018_v26 = vld [vmem:[%s1945_s2] ss:$0 sm:$0xff]  ;;  %v1295_v37 = vld [vmem:[#allocation8 + $0x38] sm:$0xff]   ;;  %v1297_v39 = vld [vmem:[#allocation10 + $0x8] sm:$0xff]   ;;  %p1455_p2 = por %p1454_p1, %p1453_p12 }
  0xa7   : > { %v1296_v38 = vld [vmem:[#allocation10] sm:$0xff]   ;;  %v1298_v40 = vld [vmem:[#allocation10 + $0x10] sm:$0xff]   ;;  %v1299_v41 = vld [vmem:[#allocation10 + $0x18] sm:$0xff]  }
  0xa8   : > { %1102 = vmatpush3.bf16.msra.mxu0 %v1274_v3  ;;  %1122 = vmatpush3.bf16.msra.mxu1 %v1282_v8  ;;  %v1300_v42 = vld [vmem:[#allocation10 + $0x20] sm:$0xff]   ;;  %v1301_v43 = vld [vmem:[#allocation10 + $0x28] sm:$0xff]   ;;  %v1302_v56 = vld [vmem:[#allocation10 + $0x30] sm:$0xff]   ;;  %p1456_p13 = pnand %p1455_p2, %p1449_p7 }
  0xa9   : > { %1103 = vmatprep.subr.bf16.mxu0 %v1531_v0  ;;  %1123 = vmatprep.subr.bf16.mxu1 %v1531_v0  ;;  %v1027_v44 = vld [vmem:[%s1946_s3] ss:$0 sm:$0xff]  ;;  %v1303_v57 = vld [vmem:[#allocation10 + $0x38] sm:$0xff]  }
  0xaa   : > { %v1036_v58 = vld [vmem:[%s1949_s6] ss:$0 sm:$0xff] }
  0xac   : > { %1104 = vmatpush3.bf16.msra.mxu0 %v1275_v5  ;;  %1124 = vmatpush3.bf16.msra.mxu1 %v1283_v10 }
  0xad   : > { %1105 = vmatprep.subr.bf16.mxu0 %v1531_v0  ;;  %1125 = vmatprep.subr.bf16.mxu1 %v1531_v0 }
  0xb0   : > { %1106 = vmatpush3.bf16.msra.mxu0 %v1276_v7  ;;  %1126 = vmatpush3.bf16.msra.mxu1 %v1284_v12 }
  0xb1   : > { %1107 = vmatprep.subr.bf16.mxu0 %v1531_v0  ;;  %1127 = vmatprep.subr.bf16.mxu1 %v1531_v0 }
  0xb4   : > { %1108 = vmatpush3.bf16.msra.mxu0 %v1277_v9  ;;  %1128 = vmatpush3.bf16.msra.mxu1 %v1285_v16 }
  0xb5   : > { %1109 = vmatprep.subr.bf16.mxu0 %v1531_v0  ;;  %1129 = vmatprep.subr.bf16.mxu1 %v1531_v0 }
  0xb8   : > { %1110 = vmatpush3.bf16.msra.mxu0 %v1278_v11  ;;  %1130 = vmatpush3.bf16.msra.mxu1 %v1286_v18 }
  0xb9   : > { %1111 = vmatprep.subr.bf16.mxu0 %v1531_v0  ;;  %1131 = vmatprep.subr.bf16.mxu1 %v1531_v0 }
  0xbc   : > { %1112 = vmatpush3.bf16.msra.mxu0 %v1279_v13  ;;  %1132 = vmatpush3.bf16.msra.mxu1 %v1287_v19 }
  0xbd   : > { %1137 = vmatprep.subr.bf16.mxu0 %v1531_v0  ;;  %1157 = vmatprep.subr.bf16.mxu1 %v1531_v0 }
  0xbf   : > { %1114 = vmatmul.mubr.bf16.vlgmr.msra.gmra.mrb[0].mxu0 %v414_v17 }
  0xc0   : > { %1153 = vmatprep.mubr.msk.bf16.mxu0 %vm1532_vm0, %v1531_v0  ;;  %1138 = vmatpush3.bf16.msra.mxu0 %v1288_v20 }
  0xc1   : > { %1139 = vmatprep.subr.bf16.mxu0 %v1531_v0 }
  0xc4   : > { %1140 = vmatpush3.bf16.msra.mxu0 %v1289_v21 }
  0xc5   : > { %1141 = vmatprep.subr.bf16.mxu0 %v1531_v0 }
  0xc8   : > { %1142 = vmatpush3.bf16.msra.mxu0 %v1290_v22 }
  0xc9   : > { %1143 = vmatprep.subr.bf16.mxu0 %v1531_v0 }
  0xcc   : > { %1144 = vmatpush3.bf16.msra.mxu0 %v1291_v23 }
  0xcd   : > { %1145 = vmatprep.subr.bf16.mxu0 %v1531_v0 }
  0xd0   : > { %1146 = vmatpush3.bf16.msra.mxu0 %v1292_v24 }
  0xd1   : > { %1147 = vmatprep.subr.bf16.mxu0 %v1531_v0 }
  0xd4   : > { %1148 = vmatpush3.bf16.msra.mxu0 %v1293_v25 }
  0xd5   : > { %1149 = vmatprep.subr.bf16.mxu0 %v1531_v0 }
  0xd8   : > { %1150 = vmatpush3.bf16.msra.mxu0 %v1294_v36 }
  0xd9   : > { %1151 = vmatprep.subr.bf16.mxu0 %v1531_v0 }
  0xdc   : > { %1152 = vmatpush3.bf16.msra.mxu0 %v1295_v37 }
 0x192   : > { %v520_v27 = vpop.f32.mrb[0].mxu0 }
 0x193   : > { %v521_v28 = vadd.f32 %v1018_v26, %v520_v27  ;;  %v1115_v29 = vpop.f32.mrb[1].mxu0 }
 0x194   : > { %v523_v30 = vpop.f32.mrb[2].mxu0 }
 0x195   : > { %v524_v31 = vadd.f32 %v1018_v26, %v523_v30  ;;  %v1116_v32 = vpop.f32.mrb[3].mxu0  ;;  %v527_v33 = vmax.f32 %v521_v28, 0.0 }
 0x197   : > { %v528_v34 = vmax.f32 %v524_v31, 0.0 }
 0x199   : > { %v529_v35 = vpack.c.bf16 %v528_v34, %v527_v33 }
 0x19b   : > { %1134 = vmatmul.mubr.bf16.vlgmr.msra.gmra.mrb[0].mxu1 %v529_v35 }
 0x19c   : > { %1173 = vmatprep.mubr.msk.bf16.mxu1 %vm1532_vm0, %v1531_v0  ;;  %1158 = vmatpush3.bf16.msra.mxu1 %v1296_v38 }
 0x19d   : > { %1159 = vmatprep.subr.bf16.mxu1 %v1531_v0 }
 0x1a0   : > { %1160 = vmatpush3.bf16.msra.mxu1 %v1297_v39 }
 0x1a1   : > { %1161 = vmatprep.subr.bf16.mxu1 %v1531_v0 }
 0x1a4   : > { %1162 = vmatpush3.bf16.msra.mxu1 %v1298_v40 }
 0x1a5   : > { %1163 = vmatprep.subr.bf16.mxu1 %v1531_v0 }
 0x1a8   : > { %1164 = vmatpush3.bf16.msra.mxu1 %v1299_v41 }
 0x1a9   : > { %1165 = vmatprep.subr.bf16.mxu1 %v1531_v0 }
 0x1ac   : > { %1166 = vmatpush3.bf16.msra.mxu1 %v1300_v42 }
 0x1ad   : > { %1167 = vmatprep.subr.bf16.mxu1 %v1531_v0 }
 0x1b0   : > { %1168 = vmatpush3.bf16.msra.mxu1 %v1301_v43 }
 0x1b1   : > { %1169 = vmatprep.subr.bf16.mxu1 %v1531_v0 }
 0x1b4   : > { %1170 = vmatpush3.bf16.msra.mxu1 %v1302_v56 }
 0x1b5   : > { %1171 = vmatprep.subr.bf16.mxu1 %v1531_v0  ;;  %v1045_v0 = vld [vmem:[%s1951_s8] ss:$0 sm:$0xff] }
 0x1b8   : > { %1172 = vmatpush3.bf16.msra.mxu1 %v1303_v57 }
 0x26e   : > { %v635_v45 = vpop.f32.mrb[0].mxu1 }
 0x26f   : > { %v636_v46 = vadd.f32 %v1027_v44, %v635_v45  ;;  %v1135_v48 = vpop.f32.mrb[1].mxu1 }
 0x270   : > { %v638_v50 = vpop.f32.mrb[2].mxu1 }
 0x271   : > { %v639_v51 = vadd.f32 %v1027_v44, %v638_v50  ;;  %v1136_v52 = vpop.f32.mrb[3].mxu1  ;;  %v644_v53 = vmin.f32 %v636_v46, %v642_v47 }
 0x273   : > { %v645_v54 = vmin.f32 %v639_v51, %v643_v49 }
 0x275   : > { %v646_v55 = vpack.c.bf16 %v645_v54, %v644_v53 }
 0x277   : > { %1154 = vmatmul.mubr.bf16.vlgmr.msra.gmra.mrb[4].mxu0 %v646_v55 }
 0x34a   : > { %v752_v59 = vpop.f32.mrb[4].mxu0 }
 0x34b   : > { %v753_v60 = vadd.f32 %v1036_v58, %v752_v59  ;;  %v1155_v61 = vpop.f32.mrb[5].mxu0 }
 0x34c   : > { %v755_v62 = vpop.f32.mrb[6].mxu0 }
 0x34d   : > { %v756_v63 = vadd.f32 %v1036_v58, %v755_v62  ;;  %v1156_v1 = vpop.f32.mrb[7].mxu0  ;;  %v759_v2 = vmax.f32 %v753_v60, 0.0 }
 0x34f   : > { %v760_v3 = vmax.f32 %v756_v63, 0.0 }
 0x351   : > { %v761_v4 = vpack.c.bf16 %v760_v3, %v759_v2 }
 0x353   : > { %1174 = vmatmul.mubr.bf16.vlgmr.msra.gmra.mrb[4].mxu1 %v761_v4 }
 0x426   : > { %v867_v5 = vpop.f32.mrb[4].mxu1 }
 0x427   : > { %v868_v6 = vadd.f32 %v1045_v0, %v867_v5  ;;  %v1175_v7 = vpop.f32.mrb[5].mxu1 }
 0x428   : > { %v870_v8 = vpop.f32.mrb[6].mxu1 }
 0x429   : > { %874 = vst [vmem:[%s408_s20] sm:$0xff] %v868_v6  ;;  %v871_v9 = vadd.f32 %v1045_v0, %v870_v8  ;;  %v1176_v10 = vpop.f32.mrb[7].mxu1 }
 0x42b   : > { %875 = vst [vmem:[%s408_s20 + $0x8] sm:$0xff] %v871_v9 }
 0x42c   : > { %1459 = shalt.err (!%p1456_p13)
}
 0x42d   : > { %s1460_s22 = scalar_lea.hbm %s1899_s17, 256  ;;  %s1464_s20 = scalar_lea.hbm %s1976_s15, 512 }
 0x42e   : > { %p1461_p9 = scmp.ne.s32.totalorder %s1899_s17, %s1460_s22  ;;  %p1465_p4 = scmp.lt.u32.totalorder %s1899_s17, %s1976_s15 }
 0x42f   : > { %p1466_p8 = scmp.lt.u32.totalorder %s1464_s20, %s1460_s22  ;;  %p1468_p3 = scmp.lt.u32.totalorder %s1460_s22, %s1899_s17 }
 0x430   : > { %p1462_p0 = pnand %p1461_p9, %p1757_p10 }
 0x431   : > { %p1467_p6 = por %p1466_p8, %p1465_p4 }
 0x432   : > { %p1463_p11 = pneg %p1462_p0 }
 0x433   : > { %p1469_p5 = por %p1468_p3, %p1467_p6 }
 0x435   : > { %p1470_p7 = pnand %p1469_p5, %p1463_p11 }
 0x437   : > { %1473 = shalt.err (!%p1470_p7)
}
 0x438   : > { %s1534_s29 = smov 128   ;;  %s1535_s13 = smov 8  }
 0x439   : > { %1195 = dma.vmem_to_hbm [thread:$0]  (%p1757_p10), %s1894_s9, 256, %s1899_s17, %s877_s25, %s1534_s29, %s1534_s29, %s1535_s13  }
 0x43a PF: > { %s1977_s21 = sld [smem:[#allocation16_spill]]  ;;  %s1978_s19 = sld [smem:[#allocation17_spill]] }
 0x43b   : > { %p1980_p1 = scmp.ge.s32.totalorder %s1520_s12, 2 }
 0x440   : > { %s905_s24 = sand.u32 1, %s1977_s21   ;;  %p1979_p12 = scmp.ne.s32.totalorder %s1978_s19, 0 }
 0x441   : > { %s906_s22 = scalar_lea.sflag [#allocation4], %s905_s24 }
 0x442   : > { %p1215_p2 = pnand %p1980_p1, %p1979_p12 }
 0x444   : > { %1503 = dma.done.wait (!%p1215_p2), %s906_s22, 256  }
 0x445   : > { %1505 = vsyncadd (!%p1215_p2), %s906_s22, 4294967040  ;;  %p24_p13 = scmp.ge.s32.totalorder %s1747_s14, 4   ;;  %s1981_s30 = smov %s1512_s10 }
 0x446   : > { %s1982_s10 = smov %s1516_s11  ;;  %s1983_s11 = smov %s1763_s28 }
 0x447   : > { %s1984_s12 = smov %s1747_s14  ;;  %26 = sbr.rel (!%p24_p13) target bundleno = 9 (0x9), region = 117 }
 0x44e   :  { %911 = vsyncpa [#allocation3], 1 }
 0x44f   :  { %913 = vsyncpa [#allocation3 + $0x1], 1 }
 0x450   :  { %914 = vsyncpa [#allocation6], 1 }
 0x451   :  { %915 = vsyncpa [#allocation9], 1 }
 0x452   :  { %916 = vsyncpa [#allocation4], 1 }
 0x453   :  { %918 = vsyncpa [#allocation4 + $0x1], 1 }

</bundles_post_ra>
